<compile_context>
chip_gen: v6e
topology: v6e:2x2x1
jax: 0.10.0
libtpu: 0.0.40
codegen_flags: <defaults>
</compile_context>

<pallas_src>
import functools
import math

import jax
import jax.numpy as jnp
from jax.experimental import pallas as pl
from jax.experimental.pallas import tpu as pltpu

LANE = 128
TM = 256  # output-row tile (256-aligned: MXU-native on v6e/v7x, ok on v5e)
TK = 256  # neighbor/contraction tile


def _round_up(x, m):
    return ((x + m - 1) // m) * m


def _sage_layer_kernel(a_ref, xk_ref, xi_ref, wl_ref, wr_ref, b_ref, o_ref,
                       acc_ref, *, apply_relu):
    """One SAGEConv layer, tiled over (row block i, neighbor block k).

    a_ref : (TM, TK)       bf16 normalized adjacency tile A[i, k]
    xk_ref: (TK, Din_pad)  bf16 neighbor features (rows of X for block k)
    xi_ref: (TM, Din_pad)  bf16 root features    (rows of X for block i)
    wl_ref: (Din_pad, Dout_pad) bf16 neighbor weight (stored so X @ W)
    wr_ref: (Din_pad, Dout_pad) bf16 root weight
    b_ref : (1, Dout_pad)  f32 bias of lin_l
    o_ref : (TM, Dout_pad) output tile
    acc_ref: (TM, Din_pad) f32 accumulator for A @ X
    """
    k = pl.program_id(1)

    @pl.when(k == 0)
    def _():
        acc_ref[...] = jnp.zeros_like(acc_ref)

    # Accumulate the mean aggregation: agg[i] += A[i, k] @ X[k]   (f32 acc)
    acc_ref[...] += jnp.dot(a_ref[...], xk_ref[...],
                            preferred_element_type=jnp.float32)

    @pl.when(k == pl.num_programs(1) - 1)
    def _():
        agg = acc_ref[...].astype(wl_ref.dtype)
        out = jnp.dot(agg, wl_ref[...], preferred_element_type=jnp.float32)
        out = out + jnp.dot(xi_ref[...], wr_ref[...],
                            preferred_element_type=jnp.float32)
        out = out + b_ref[...]  # (1, Dout_pad) broadcast, epilogue only
        if apply_relu:
            out = jnp.maximum(out, 0.0)
        o_ref[...] = out.astype(o_ref.dtype)


def sage_layer(a_norm, x, w_l, w_r, b, *, apply_relu, out_dtype):
    """Tiled pallas_call for one SAGEConv layer on padded bf16 operands."""
    n_pad = a_norm.shape[0]
    d_in = x.shape[1]
    d_out = w_l.shape[1]
    tm = min(TM, n_pad)
    tk = min(TK, n_pad)
    grid = (n_pad // tm, n_pad // tk)

    flops = 2 * n_pad * n_pad * d_in + 2 * 2 * n_pad * d_in * d_out
    bytes_accessed = (
        a_norm.size * a_norm.dtype.itemsize
        + 2 * x.size * x.dtype.itemsize
        + w_l.size * w_l.dtype.itemsize
        + w_r.size * w_r.dtype.itemsize
        + b.size * b.dtype.itemsize
        + n_pad * d_out * jnp.dtype(out_dtype).itemsize)

    kernel = functools.partial(_sage_layer_kernel, apply_relu=apply_relu)
    return pl.pallas_call(
        kernel,
        out_shape=jax.ShapeDtypeStruct((n_pad, d_out), out_dtype),
        grid_spec=pltpu.PrefetchScalarGridSpec(
            num_scalar_prefetch=0,
            grid=grid,
            in_specs=[
                pl.BlockSpec((tm, tk), lambda i, k: (i, k)),        # A tile
                pl.BlockSpec((tk, d_in), lambda i, k: (k, 0)),      # X (neighbors)
                pl.BlockSpec((tm, d_in), lambda i, k: (i, 0)),      # X (roots)
                pl.BlockSpec((d_in, d_out), lambda i, k: (0, 0)),   # W_l
                pl.BlockSpec((d_in, d_out), lambda i, k: (0, 0)),   # W_r
                pl.BlockSpec((1, d_out), lambda i, k: (0, 0)),      # bias
            ],
            out_specs=pl.BlockSpec((tm, d_out), lambda i, k: (i, 0)),
            scratch_shapes=[pltpu.VMEM((tm, d_in), jnp.float32)],
        ),
        compiler_params=pltpu.CompilerParams(
            dimension_semantics=("parallel", "arbitrary")),
        cost_estimate=pl.CostEstimate(
            flops=int(flops), transcendentals=0,
            bytes_accessed=int(bytes_accessed)),
    )(a_norm, x, x, w_l, w_r, b)


def build_mean_adjacency(nbrs, num_nodes, n_pad):
    """Padded bf16 normalized adjacency for mean aggregation.

    A_norm[i, j] = (# edges j -> i) / deg_in(i); zero-in-degree rows stay 0.
    Rows/cols >= num_nodes are zero padding.
    """
    # TODO(synk): for large sparse graphs replace this dense O(N^2) adjacency
    # with a sorted-edge gather aggregation using PrefetchScalarGridSpec.
    src = nbrs[0]
    dst = nbrs[1]
    a = jnp.zeros((n_pad, n_pad), jnp.float32).at[dst, src].add(1.0)
    deg = a.sum(axis=1, keepdims=True)
    a = a / jnp.maximum(deg, 1.0)
    return a.astype(jnp.bfloat16)


def init_sage_params(key, dims):
    """Deterministic per-layer params, zero-padded to 128-lane multiples.

    Layer i: W_l, W_r of logical shape (dims[i], dims[i+1]) stored transposed
    (so X @ W) inside padded (Din_pad, Dout_pad) f32 arrays; bias (1, Dout_pad).
    """
    params = []
    for i in range(len(dims) - 1):
        d_in, d_out = dims[i], dims[i + 1]
        d_in_p = _round_up(d_in, LANE)
        d_out_p = _round_up(d_out, LANE)
        key, k1, k2, k3 = jax.random.split(key, 4)
        bound = 1.0 / math.sqrt(d_in)
        w_l = jax.random.uniform(k1, (d_in, d_out), jnp.float32, -bound, bound)
        w_r = jax.random.uniform(k2, (d_in, d_out), jnp.float32, -bound, bound)
        b = jax.random.uniform(k3, (1, d_out), jnp.float32, -bound, bound)
        w_l_p = jnp.zeros((d_in_p, d_out_p), jnp.float32).at[:d_in, :d_out].set(w_l)
        w_r_p = jnp.zeros((d_in_p, d_out_p), jnp.float32).at[:d_in, :d_out].set(w_r)
        b_p = jnp.zeros((1, d_out_p), jnp.float32).at[:, :d_out].set(b)
        params.append((w_l_p, w_r_p, b_p))
    return params


def sage_forward(x, nbrs, num_root, params, dims):
    n = x.shape[0]
    n_pad = _round_up(n, max(TM, TK))
    d_in_pad = _round_up(dims[0], LANE)

    # Zero-pad nodes and features; bf16 activations, f32 kept only in acc.
    h = jnp.zeros((n_pad, d_in_pad), jnp.float32).at[:n, :dims[0]].set(x)
    h = h.astype(jnp.bfloat16)
    a_norm = build_mean_adjacency(nbrs, n, n_pad)

    num_layers = len(params)
    for i, (w_l, w_r, b) in enumerate(params):
        last = (i == num_layers - 1)
        h = sage_layer(
            a_norm, h,
            w_l.astype(jnp.bfloat16), w_r.astype(jnp.bfloat16), b,
            apply_relu=not last,
            out_dtype=jnp.float32 if last else jnp.bfloat16)
    return h[:num_root, :dims[-1]]


def sage_reference(x, nbrs, num_root, params, dims):
    """Pure-JAX reference with the same bf16 quantization points as the kernel."""
    n = x.shape[0]
    src, dst = nbrs[0], nbrs[1]
    a = jnp.zeros((n, n), jnp.float32).at[dst, src].add(1.0)
    deg = a.sum(axis=1, keepdims=True)
    a = (a / jnp.maximum(deg, 1.0)).astype(jnp.bfloat16).astype(jnp.float32)

    h = x.astype(jnp.bfloat16).astype(jnp.float32)
    num_layers = len(params)
    for i, (w_l, w_r, b) in enumerate(params):
        d_in, d_out = dims[i], dims[i + 1]
        wl = w_l[:d_in, :d_out].astype(jnp.bfloat16).astype(jnp.float32)
        wr = w_r[:d_in, :d_out].astype(jnp.bfloat16).astype(jnp.float32)
        bb = b[:, :d_out]
        agg = (a @ h).astype(jnp.bfloat16).astype(jnp.float32)
        out = agg @ wl + h @ wr + bb
        if i < num_layers - 1:
            out = jnp.maximum(out, 0.0).astype(jnp.bfloat16).astype(jnp.float32)
        h = out
    return h[:num_root]


if __name__ == "__main__":
    key = jax.random.PRNGKey(0)

    # Small synthetic graph: 300 nodes (padded to 512 -> 2x2 grid per layer),
    # 1500 edges, dims = [8, 16, 8], 10 root nodes.
    num_nodes = 300
    num_edges = 1500
    num_root = 10
    dims = [8, 16, 8]

    key, kx, ke_src, ke_dst, kp = jax.random.split(key, 5)
    x = jax.random.normal(kx, (num_nodes, dims[0]), jnp.float32)
    src = jax.random.randint(ke_src, (num_edges,), 0, num_nodes, jnp.int32)
    dst = jax.random.randint(ke_dst, (num_edges,), 0, num_nodes, jnp.int32)
    nbrs = jnp.stack([src, dst], axis=0)  # edge_index, shape (2, E)

    params = init_sage_params(kp, dims)

    out = sage_forward(x, nbrs, num_root, params, dims)
    out = jax.block_until_ready(out)

    ref = sage_reference(x, nbrs, num_root, params, dims)
    assert out.shape == (num_root, dims[-1])
    assert jnp.allclose(out, ref, atol=2e-2, rtol=2e-2), (
        float(jnp.max(jnp.abs(out - ref))))

    print("KERNEL_OK")
</pallas_src>

<mosaic_0001>
module attributes {stable_mosaic.version = 11 : i64} {
  func.func @_sage_layer_kernel(%arg0: i32, %arg1: i32, %arg2: memref<256x256xbf16, #tpu.memory_space<vmem>>, %arg3: memref<256x128xbf16, #tpu.memory_space<vmem>>, %arg4: memref<256x128xbf16, #tpu.memory_space<vmem>>, %arg5: memref<128x128xbf16, #tpu.memory_space<vmem>>, %arg6: memref<128x128xbf16, #tpu.memory_space<vmem>>, %arg7: memref<1x128xf32, #tpu.memory_space<vmem>>, %arg8: memref<256x128xbf16, #tpu.memory_space<vmem>>, %arg9: memref<256x128xf32, #tpu.memory_space<vmem>>) attributes {dimension_semantics = [#tpu.dimension_semantics<parallel>, #tpu.dimension_semantics<arbitrary>], iteration_bounds = array<i64: 2, 2>, scalar_prefetch = 0 : i64, scratch_operands = 1 : i64, tpu.core_type = #tpu.core_type<tc>, window_params = [{transform_indices = @transform_0, window_bounds = array<i64: 256, 256>}, {transform_indices = @transform_1, window_bounds = array<i64: 256, 128>}, {transform_indices = @transform_2, window_bounds = array<i64: 256, 128>}, {pipeline_mode = #tpu.pipeline_mode<synchronous>, transform_indices = @transform_3, window_bounds = array<i64: 128, 128>}, {pipeline_mode = #tpu.pipeline_mode<synchronous>, transform_indices = @transform_4, window_bounds = array<i64: 128, 128>}, {pipeline_mode = #tpu.pipeline_mode<synchronous>, transform_indices = @transform_5, window_bounds = array<i64: 1, 128>}, {transform_indices = @transform_6, window_bounds = array<i64: 256, 128>}]} {
    %c0_i32 = arith.constant 0 : i32
    %0 = arith.cmpi eq, %arg1, %c0_i32 : i32
    %1 = arith.extui %0 : i1 to i32
    %c0_i32_0 = arith.constant 0 : i32
    %2 = arith.cmpi ne, %1, %c0_i32_0 : i32
    scf.if %2 {
      %cst_9 = arith.constant 0.000000e+00 : f32
      %12 = vector.broadcast %cst_9 : f32 to vector<256x128xf32>
      %c0_10 = arith.constant 0 : index
      %c0_11 = arith.constant 0 : index
      %13 = vector.load %arg9[%c0_10, %c0_11] : memref<256x128xf32, #tpu.memory_space<vmem>>, vector<256x128xf32>
      tpu.vector_store %arg9[%c0_10, %c0_11], %12 {strides = array<i32>} : memref<256x128xf32, #tpu.memory_space<vmem>>, vector<256x128xf32>,
    } else {
    }
    %c0 = arith.constant 0 : index
    %c0_1 = arith.constant 0 : index
    %3 = vector.load %arg9[%c0, %c0_1] : memref<256x128xf32, #tpu.memory_space<vmem>>, vector<256x128xf32>
    %c0_2 = arith.constant 0 : index
    %c0_3 = arith.constant 0 : index
    %4 = vector.load %arg2[%c0_2, %c0_3] : memref<256x256xbf16, #tpu.memory_space<vmem>>, vector<256x256xbf16>
    %c0_4 = arith.constant 0 : index
    %c0_5 = arith.constant 0 : index
    %5 = vector.load %arg3[%c0_4, %c0_5] : memref<256x128xbf16, #tpu.memory_space<vmem>>, vector<256x128xbf16>
    %cst = arith.constant dense<0.000000e+00> : vector<256x128xf32>
    %6 = tpu.matmul %4, %5, %cst {dimension_numbers = #tpu.dot_dimension_numbers<[1], [0], [0], [1], [0, 0, 1, 1], [], []>} : vector<256x256xbf16>, vector<256x128xbf16>, vector<256x128xf32> -> vector<256x128xf32>
    %7 = arith.addf %3, %6 : vector<256x128xf32>
    %c0_6 = arith.constant 0 : index
    %c0_7 = arith.constant 0 : index
    %8 = vector.load %arg9[%c0_6, %c0_7] : memref<256x128xf32, #tpu.memory_space<vmem>>, vector<256x128xf32>
    tpu.vector_store %arg9[%c0_6, %c0_7], %7 {strides = array<i32>} : memref<256x128xf32, #tpu.memory_space<vmem>>, vector<256x128xf32>,
    %c1_i32 = arith.constant 1 : i32
    %9 = arith.cmpi eq, %arg1, %c1_i32 : i32
    %10 = arith.extui %9 : i1 to i32
    %c0_i32_8 = arith.constant 0 : i32
    %11 = arith.cmpi ne, %10, %c0_i32_8 : i32
    scf.if %11 {
      %c0_9 = arith.constant 0 : index
      %c0_10 = arith.constant 0 : index
      %12 = vector.load %arg9[%c0_9, %c0_10] : memref<256x128xf32, #tpu.memory_space<vmem>>, vector<256x128xf32>
      %13 = arith.truncf %12 : vector<256x128xf32> to vector<256x128xbf16>
      %c0_11 = arith.constant 0 : index
      %c0_12 = arith.constant 0 : index
      %14 = vector.load %arg5[%c0_11, %c0_12] : memref<128x128xbf16, #tpu.memory_space<vmem>>, vector<128x128xbf16>
      %cst_13 = arith.constant dense<0.000000e+00> : vector<256x128xf32>
      %15 = tpu.matmul %13, %14, %cst_13 {dimension_numbers = #tpu.dot_dimension_numbers<[1], [0], [0], [1], [0, 0, 1, 1], [], []>} : vector<256x128xbf16>, vector<128x128xbf16>, vector<256x128xf32> -> vector<256x128xf32>
      %c0_14 = arith.constant 0 : index
      %c0_15 = arith.constant 0 : index
      %16 = vector.load %arg4[%c0_14, %c0_15] : memref<256x128xbf16, #tpu.memory_space<vmem>>, vector<256x128xbf16>
      %c0_16 = arith.constant 0 : index
      %c0_17 = arith.constant 0 : index
      %17 = vector.load %arg6[%c0_16, %c0_17] : memref<128x128xbf16, #tpu.memory_space<vmem>>, vector<128x128xbf16>
      %cst_18 = arith.constant dense<0.000000e+00> : vector<256x128xf32>
      %18 = tpu.matmul %16, %17, %cst_18 {dimension_numbers = #tpu.dot_dimension_numbers<[1], [0], [0], [1], [0, 0, 1, 1], [], []>} : vector<256x128xbf16>, vector<128x128xbf16>, vector<256x128xf32> -> vector<256x128xf32>
      %19 = arith.addf %15, %18 : vector<256x128xf32>
      %c0_19 = arith.constant 0 : index
      %c0_20 = arith.constant 0 : index
      %20 = vector.load %arg7[%c0_19, %c0_20] : memref<1x128xf32, #tpu.memory_space<vmem>>, vector<1x128xf32>
      %21 = vector.broadcast %20 : vector<1x128xf32> to vector<256x128xf32>
      %22 = arith.addf %19, %21 : vector<256x128xf32>
      %cst_21 = arith.constant 0.000000e+00 : f32
      %23 = vector.broadcast %cst_21 : f32 to vector<256x128xf32>
      %24 = arith.maximumf %22, %23 : vector<256x128xf32>
      %25 = arith.truncf %24 : vector<256x128xf32> to vector<256x128xbf16>
      %c0_22 = arith.constant 0 : index
      %c0_23 = arith.constant 0 : index
      %26 = vector.load %arg8[%c0_22, %c0_23] : memref<256x128xbf16, #tpu.memory_space<vmem>>, vector<256x128xbf16>
      tpu.vector_store %arg8[%c0_22, %c0_23], %25 {strides = array<i32>} : memref<256x128xbf16, #tpu.memory_space<vmem>>, vector<256x128xbf16>,
    } else {
    }
    return
  }
  func.func @transform_0(%arg0: i32, %arg1: i32) -> (i32, i32) {
    %c0_i32 = arith.constant 0 : i32
    return %arg0, %arg1 : i32, i32
  }
  func.func @transform_1(%arg0: i32, %arg1: i32) -> (i32, i32) {
    %c0_i32 = arith.constant 0 : i32
    %c0_i32_0 = arith.constant 0 : i32
    return %arg1, %c0_i32 : i32, i32
  }
  func.func @transform_2(%arg0: i32, %arg1: i32) -> (i32, i32) {
    %c0_i32 = arith.constant 0 : i32
    %c0_i32_0 = arith.constant 0 : i32
    return %arg0, %c0_i32 : i32, i32
  }
  func.func @transform_3(%arg0: i32, %arg1: i32) -> (i32, i32) {
    %c0_i32 = arith.constant 0 : i32
    %c0_i32_0 = arith.constant 0 : i32
    %c0_i32_1 = arith.constant 0 : i32
    return %c0_i32, %c0_i32_0 : i32, i32
  }
  func.func @transform_4(%arg0: i32, %arg1: i32) -> (i32, i32) {
    %c0_i32 = arith.constant 0 : i32
    %c0_i32_0 = arith.constant 0 : i32
    %c0_i32_1 = arith.constant 0 : i32
    return %c0_i32, %c0_i32_0 : i32, i32
  }
  func.func @transform_5(%arg0: i32, %arg1: i32) -> (i32, i32) {
    %c0_i32 = arith.constant 0 : i32
    %c0_i32_0 = arith.constant 0 : i32
    %c0_i32_1 = arith.constant 0 : i32
    return %c0_i32, %c0_i32_0 : i32, i32
  }
  func.func @transform_6(%arg0: i32, %arg1: i32) -> (i32, i32) {
    %c0_i32 = arith.constant 0 : i32
    %c0_i32_0 = arith.constant 0 : i32
    return %arg0, %c0_i32 : i32, i32
  }
}

</mosaic_0001>

<bundles_post_ra>
// kernel: tpu_custom_call.1
= control target key start
LH: loop header
LB: loop body
LE: loop exit
PB: predicated region body
PF: predicated region fallthrough
CT: control target
= control target key end

     0   :  { %s3684_s0 = inlined_call_operand.hbm [shape: bf16[512,512], index: 0, kind: input, shape index: {}]   ;;  %s3685_s1 = inlined_call_operand.hbm [shape: bf16[512,128], index: 1, kind: input, shape index: {}]   ;;  %s3686_s2 = inlined_call_operand.hbm [shape: bf16[512,128], index: 2, kind: input, shape index: {}]   ;;  %s3687_s3 = inlined_call_operand.hbm [shape: bf16[128,128], index: 3, kind: input, shape index: {}]   ;;  %s3688_s4 = inlined_call_operand.hbm [shape: bf16[128,128], index: 4, kind: input, shape index: {}]   ;;  %s3689_s5 = inlined_call_operand.vmem [shape: f32[1,128], index: 5, kind: input, shape index: {}]   ;;  %s3690_s6 = inlined_call_operand.hbm [shape: bf16[512,128], index: 6, kind: output, shape index: {}]  }
   0x1   :  { %3707 = sst [smem:[#allocation26_spill]] %s3684_s0 }
   0x2   :  { %3708 = sst [smem:[#allocation27_spill]] %s3685_s1 }
   0x3   :  { %3709 = sst [smem:[#allocation28_spill]] %s3686_s2 }
   0x4   :  { %3710 = sst [smem:[#allocation29_spill]] %s3687_s3 }
   0x5   :  { %3711 = sst [smem:[#allocation30_spill]] %s3688_s4 }
   0x6   :  { %3712 = sst [smem:[#allocation31_spill]] %s3689_s5 }
   0x7   :  { %3713 = sst [smem:[#allocation32_spill]] %s3690_s6 }
   0x8   :  { %11 = vsyncpa [#allocation4], 0 }
   0x9   :  { %13 = vsyncpa [#allocation4 + $0x1], 0 }
   0xa   :  { %14 = vsyncpa [#allocation7], 0 }
   0xb   :  { %16 = vsyncpa [#allocation7 + $0x1], 0 }
   0xc   :  { %17 = vsyncpa [#allocation10], 0 }
   0xd   :  { %18 = vsyncpa [#allocation5], 0 }
   0xe   :  { %20 = vsyncpa [#allocation5 + $0x1], 0  ;;  %s3187_s21 = smov 0   ;;  %s3189_s22 = smov 0  }
   0xf   :  { %s3191_s23 = smov 0   ;;  %s3193_s24 = smov 0  }
  0x10   :  { %s3195_s25 = smov 0   ;;  %s3197_s26 = smov 0  }
  0x11   :  { %s3199_s27 = smov 0   ;;  %s3201_s28 = smov 0  }
  0x12   :  { %s3203_s29 = smov 0   ;;  %s3205_s30 = smov 0  }
  0x13   :  { %s3207_s7 = smov 0   ;;  %s3209_s8 = smov 0  }
  0x14   :  { %s3211_s9 = smov 0   ;;  %s3213_s10 = smov 0  }
  0x15 LB: > { %3714 = sst [smem:[#allocation18_spill]] %s3100_s25  ;;  %s3258_s11 = sadd.s32 4294967295, %s3136_s10   ;;  %s3136_s10 = sphi %s3213_s10, %s26_s10   ;;  %s3132_s9 = sphi %s3211_s9, %s3779_s9   ;;  %s3128_s8 = sphi %s3209_s8, %s3778_s8   ;;  %s3124_s7 = sphi %s3207_s7, %s3777_s7   ;;  %s3120_s30 = sphi %s3205_s30, %s3776_s30   ;;  %s3116_s29 = sphi %s3203_s29, %s3775_s29   ;;  %s3112_s28 = sphi %s3201_s28, %s3774_s28   ;;  %s3108_s27 = sphi %s3199_s27, %s3773_s27   ;;  %s3104_s26 = sphi %s3197_s26, %s3772_s26   ;;  %s3100_s25 = sphi %s3195_s25, %s3771_s25   ;;  %s3096_s24 = sphi %s3193_s24, %s3764_s24   ;;  %s3092_s23 = sphi %s3191_s23, %s3770_s23   ;;  %s3088_s22 = sphi %s3189_s22, %s3769_s22   ;;  %s3084_s21 = sphi %s3187_s21, %s3768_s21  }
  0x16   : > { %3715 = sst [smem:[#allocation19_spill]] %s3120_s30  ;;  %p2038_p0 = scmp.ge.s32.totalorder %s3136_s10, 1 }
  0x17   : > { %3716 = sst [smem:[#allocation20_spill]] %s3124_s7  ;;  %p3703_p1 = scmp.eq.s32.totalorder %s3258_s11, 0 }
  0x18   : > { %p212_p3 = scmp.lt.s32.totalorder %s3136_s10, 5  ;;  %s3138_s13 = smov [#allocation9]  }
  0x19   : > { %s224_s14 = sshll.u32 %s3138_s13, 4  ;;  %s225_s14 = int_to_ptr.vmem [resolvable:$true] %s224_s14 }
  0x1a   : > { %p3264_p4 = pnand %p2038_p0, %p212_p3  ;;  %s2855_s16 = scalar_lea.vmem %s225_s14, 1024 }
  0x1b   : > { %p2856_p8 = scmp.ne.s32.totalorder %s225_s14, %s2855_s16  ;;  %p2863_p11 = scmp.lt.s32.totalorder %s225_s14, %s225_s14 }
  0x1c   : > { %s3717_s12 = scalar_select %p3264_p4, 1, 0 }
  0x1d   : > { %p2599_p5 = pneg %p3264_p4  ;;  %p2864_p12 = scmp.lt.s32.totalorder %s2855_s16, %s2855_s16 }
  0x1e   : > { %3718 = sst [smem:[#allocation21_spill]] %s3717_s12 }
  0x1f   : > { %p3272_p6 = pnand %p2599_p5, %p3703_p1  ;;  %p2865_p13 = por %p2864_p12, %p2863_p11 }
  0x21   : > { %p2846_p7 = pneg %p3272_p6 }
  0x23   : > { %p2858_p9 = pnand %p2856_p8, %p2846_p7 }
  0x25   : > { %p2859_p10 = pneg %p2858_p9 }
  0x27   : > { %p2866_p0 = pnand %p2865_p13, %p2859_p10 }
  0x29   : > { %2869 = shalt.err (!%p2866_p0)
}
  0x2a   : > { %s3692_s17 = smov 64   ;;  %s3694_s18 = smov 4  }
  0x2b   : > { %s3720_s3 = sld [smem:[#allocation29_spill]]  ;;  %s35_s13 = sadd.s32 1, %s3128_s8 }
  0x2c   : > { %s38_s16 = sadd.s32 1, %s3132_s9  ;;  %p36_p3 = scmp.ge.s32.totalorder %s35_s13, 2 }
  0x2d   : > { %p3704_p5 = scmp.eq.s32.totalorder %s3136_s10, 0  ;;  %s73_s6 = sadd.s32 1, %s3104_s26 }
  0x2e   : > { %p80_p8 = scmp.ne.s32.totalorder %s3104_s26, %s3100_s25  ;;  %s3781_s13 = smov (%p36_p3, %s35_s13), 0 }
  0x2f   : > { %3721 = sst [smem:[#allocation22_spill]] %s3781_s13  ;;  %s3783_s16 = smov (!%p36_p3, %s38_s16), %s3132_s9 }
  0x30   : > { %s43_s7 = ssub.s32 %s3128_s8, %s3781_s13  ;;  %p3302_p9 = por %p80_p8, %p3704_p5 }
  0x31   : > { %2602 = dma.hbm_to_vmem [thread:$0]  (!%p3272_p6), %s3720_s3, 1024, %s225_s14, [#allocation10], %s3692_s17, %s3692_s17, %s3694_s18  }
  0x32   : > { %p40_p10 = scmp.ge.s32.totalorder %s3783_s16, 2  ;;  %p71_p11 = scmp.eq.s32.totalorder %s43_s7, 0 }
  0x33   : > { %p86_p12 = scmp.ne.s32.totalorder %s3100_s25, %s3096_s24  ;;  %p3702_p13 = scmp.lt.s32.totalorder %s3136_s10, 4 }
  0x34   : > { %s3785_s16 = smov (%p40_p10, %s3783_s16), 0  ;;  %s278_s3 = sand.u32 1, %s3136_s10  }
  0x35   : > { %3723 = sst [smem:[#allocation23_spill]] %s3785_s16  ;;  %s3316_s20 = ssub.s32 %s3132_s9, %s3785_s16 }
  0x36   : > { %s3312_s19 = scalar_select %p71_p11, %s3104_s26, %s73_s6  }
  0x37   : > { %p3320_p0 = por %p86_p12, %p3703_p1  ;;  %s44_s18 = sor.u32 %s43_s7, %s3316_s20 }
  0x38   : > { %3724 = sst [smem:[#allocation24_spill]] %s3312_s19  ;;  %p3326_p8 = scmp.eq.s32.totalorder %s44_s18, 0 }
  0x39   : > { %s3725_s17 = scalar_select %p3320_p0, 1, 0 }
  0x3a   : > { %s280_s13 = sand.u32 1, %s3104_s26   ;;  %s2181_s6 = sshll.u32 %s3128_s8, 11 }
  0x3b   : > { %3726 = sst [smem:[#allocation25_spill]] %s3725_s17  ;;  %s2047_s5 = sshll.u32 %s280_s13, 7 }
  0x3c   : > { %s3728_s1 = sld [smem:[#allocation27_spill]]  ;;  %s282_s25 = scalar_lea.vmem [#allocation6], %s2047_s5 }
  0x3d   : > { %s289_s12 = sshll.u32 %s282_s25, 4  ;;  %p3340_p10 = pnand %p3702_p13, %p3302_p9  ;;  %s290_s12 = int_to_ptr.vmem [resolvable:$true] %s289_s12 }
  0x3e   : > { %s3141_s7 = smov [#allocation11]   ;;  %s3344_s2 = scalar_lea.sflag [#allocation7], %s278_s3 }
  0x3f   : > { %s237_s18 = sshll.u32 %s3141_s7, 4  ;;  %p2872_p11 = pneg %p3340_p10  ;;  %s238_s18 = int_to_ptr.vmem [resolvable:$true] %s237_s18 }
  0x40   : > { %s2883_s13 = scalar_lea.vmem %s290_s12, 2048  ;;  %s3142_s5 = smov [#allocation6]  }
  0x41   : > { %p2884_p12 = scmp.ne.s32.totalorder %s290_s12, %s2883_s13  ;;  %s2888_s25 = sshll.u32 %s3142_s5, 4  ;;  %s2889_s25 = int_to_ptr.vmem [resolvable:$false] %s2888_s25 }
  0x42   : > { %s288_s30 = scalar_lea.hbm %s3728_s1, %s2181_s6  ;;  %s2890_s16 = scalar_lea.vmem %s2889_s25, 4096 }
  0x43   : > { %p2886_p2 = pnand %p2884_p12, %p2872_p11  ;;  %p2891_p9 = scmp.lt.s32.totalorder %s290_s12, %s2889_s25 }
  0x44   : > { %p2892_p13 = scmp.lt.s32.totalorder %s2890_s16, %s2883_s13 }
  0x45   : > { %p2887_p3 = pneg %p2886_p2 }
  0x46   : > { %p2893_p1 = por %p2892_p13, %p2891_p9 }
  0x48   : > { %p2894_p5 = pnand %p2893_p1, %p2887_p3 }
  0x4a   : > { %2897 = shalt.err (!%p2894_p5)
}
  0x4b   : > { %s3730_s14 = smov 4   ;;  %s3731_s3 = smov 64  }
  0x4c   : > { %2612 = dma.hbm_to_vmem [thread:$0]  (!%p3340_p10), %s288_s30, 2048, %s290_s12, %s3344_s2, %s3731_s3, %s3731_s3, %s3730_s14  }
  0x4d   : > { %s2909_s19 = scalar_lea.vmem %s238_s18, 1024  ;;  %p2917_p0 = scmp.lt.s32.totalorder %s238_s18, %s238_s18 }
  0x4e   : > { %p2910_p2 = scmp.ne.s32.totalorder %s238_s18, %s2909_s19  ;;  %p2918_p4 = scmp.lt.s32.totalorder %s2909_s19, %s2909_s19 }
  0x50   : > { %p2912_p11 = pnand %p2910_p2, %p2846_p7  ;;  %p2919_p13 = por %p2918_p4, %p2917_p0 }
  0x52   : > { %p2913_p12 = pneg %p2912_p11 }
  0x54   : > { %p2920_p1 = pnand %p2919_p13, %p2913_p12 }
  0x56   : > { %2923 = shalt.err (!%p2920_p1)
}
  0x57   : > { %s3732_s4 = sld [smem:[#allocation30_spill]]  ;;  %s47_s30 = sadd.s32 1, %s3116_s29 }
  0x58   : > { %s3369_s12 = scalar_select %p3326_p8, %s3116_s29, %s47_s30  }
  0x59   : > { %p54_p4 = scmp.ne.s32.totalorder %s3116_s29, %s3112_s28  ;;  %p60_p7 = scmp.ne.s32.totalorder %s3112_s28, %s3108_s27 }
  0x5a   : > { %s254_s15 = sand.u32 1, %s3116_s29   ;;  %s2044_s7 = sshll.u32 %s3128_s8, 1 }
  0x5b   : > { %p3733_p5 = scmp.eq.s32.totalorder %s3136_s10, 0  ;;  %p3734_p3 = scmp.eq.s32.totalorder %s3258_s11, 0 }
  0x5c   : > { %s2042_s5 = sshll.u32 %s254_s15, 8  ;;  %s2180_s25 = sshll.u32 %s3132_s9, 7 }
  0x5d   : > { %2605 = dma.hbm_to_vmem [thread:$0]  (!%p3272_p6), %s3732_s4, 1024, %s238_s18, [#allocation10], %s3731_s3, %s3731_s3, %s3730_s14  }
  0x5e   : > { %p56_p0 = por %p3733_p5, %p54_p4  ;;  %p3381_p10 = por %p3734_p3, %p60_p7 }
  0x5f   : > { %s265_s16 = sadd.s32 %s2180_s25, %s2044_s7  ;;  %s258_s18 = scalar_lea.vmem [#allocation3], %s2042_s5 }
  0x60   : > { %s268_s19 = sshll.u32 %s258_s18, 4  ;;  %s2046_s24 = sshll.u32 %s265_s16, 6  ;;  %s269_s19 = int_to_ptr.vmem [resolvable:$true] %s268_s19 }
  0x61   : > { %s3736_s0 = sld [smem:[#allocation26_spill]]  ;;  %p3737_p6 = scmp.lt.s32.totalorder %s3136_s10, 4 }
  0x62   : > { %s255_s1 = scalar_lea.sflag [#allocation4], %s254_s15  ;;  %s2937_s4 = scalar_lea.vmem %s269_s19, 4096 }
  0x63   : > { %p3391_p8 = pnand %p3737_p6, %p56_p0  ;;  %p2938_p2 = scmp.ne.s32.totalorder %s269_s19, %s2937_s4 }
  0x64   : > { %s3143_s7 = smov [#allocation3]  }
  0x65   : > { %p2926_p9 = pneg %p3391_p8  ;;  %s2942_s5 = sshll.u32 %s3143_s7, 4  ;;  %s2943_s5 = int_to_ptr.vmem [resolvable:$false] %s2942_s5 }
  0x66   : > { %s2944_s25 = scalar_lea.vmem %s2943_s5, 8192  ;;  %p2945_p13 = scmp.lt.s32.totalorder %s269_s19, %s2943_s5 }
  0x67   : > { %s267_s27 = scalar_lea.hbm %s3736_s0, %s2046_s24  ;;  %p2940_p11 = pnand %p2938_p2, %p2926_p9 }
  0x68   : > { %p2946_p1 = scmp.lt.s32.totalorder %s2944_s25, %s2937_s4 }
  0x69   : > { %p2941_p12 = pneg %p2940_p11 }
  0x6a   : > { %p2947_p4 = por %p2946_p1, %p2945_p13 }
  0x6c   : > { %p2948_p7 = pnand %p2947_p4, %p2941_p12 }
  0x6e   : > { %2951 = shalt.err (!%p2948_p7)
}
  0x6f   : > { %s3144_s16 = smov 256   ;;  %s3145_s15 = smov 128  }
  0x70   : > { %s3146_s4 = smov 8   ;;  %s2037_s18 = sadd.s32 4294967294, %s3136_s10  }
  0x71   : > { %2609 = dma.hbm_to_vmem [thread:$0]  (!%p3391_p8), %s267_s27, 4096, %s269_s19, %s255_s1, %s3144_s16, %s3145_s15, %s3146_s4  }
  0x72   : > { %s99_s24 = sadd.s32 1, %s3092_s23  ;;  %p3739_p5 = scmp.eq.s32.totalorder %s3316_s20, 0 }
  0x73   : > { %p106_p0 = scmp.ne.s32.totalorder %s3092_s23, %s3088_s22  ;;  %p112_p3 = scmp.ne.s32.totalorder %s3088_s22, %s3084_s21 }
  0x74   : > { %s3404_s17 = scalar_select %p3739_p5, %s3092_s23, %s99_s24  }
  0x75   : > { %p205_p6 = scmp.eq.s32.totalorder %s2037_s18, 3  ;;  %s301_s6 = sand.u32 1, %s3092_s23  }
  0x76   : > { %p3740_p9 = scmp.eq.s32.totalorder %s3136_s10, 0  ;;  %p3741_p11 = scmp.eq.s32.totalorder %s3258_s11, 0 }
  0x77   : > { %p3743_p13 = scmp.eq.s32.totalorder %s3258_s11, 3  ;;  %p3425_p8 = por %p205_p6, %p112_p3 }
  0x78   : > { %p108_p2 = por %p106_p0, %p3740_p9  ;;  %p3415_p12 = por %p112_p3, %p3741_p11 }
  0x79   : > { %p3421_p1 = por %p3743_p13, %p106_p0  ;;  %s2050_s19 = sshll.u32 %s301_s6, 7 }
  0x7a   : > { %s3745_s20 = scalar_select %p3425_p8, 1, 0 }
  0x7b   : > { %s2182_s27 = sshll.u32 %s3132_s9, 11  ;;  %s3746_s25 = sld [smem:[#allocation28_spill]] }
  0x7c   : > { %s303_s15 = scalar_lea.vmem [#allocation8], %s2050_s19  ;;  %p3747_p4 = scmp.lt.s32.totalorder %s3136_s10, 4 }
  0x7d   : > { %s310_s4 = sshll.u32 %s303_s15, 4  ;;  %s3147_s6 = smov [#allocation8]   ;;  %s311_s4 = int_to_ptr.vmem [resolvable:$true] %s310_s4 }
  0x7e   : > { %p3435_p7 = pnand %p3747_p4, %p108_p2  ;;  %s2965_s24 = scalar_lea.vmem %s311_s4, 2048 }
  0x7f   : > { %p2966_p0 = scmp.ne.s32.totalorder %s311_s4, %s2965_s24  ;;  %s2970_s0 = sshll.u32 %s3147_s6, 4  ;;  %s2971_s0 = int_to_ptr.vmem [resolvable:$false] %s2970_s0 }
  0x80   : > { %p2954_p5 = pneg %p3435_p7  ;;  %s2972_s30 = scalar_lea.vmem %s2971_s0, 4096 }
  0x81   : > { %s309_s16 = scalar_lea.hbm %s3746_s25, %s2182_s27  ;;  %p2973_p9 = scmp.lt.s32.totalorder %s311_s4, %s2971_s0 }
  0x82   : > { %p2968_p3 = pnand %p2966_p0, %p2954_p5  ;;  %p2974_p11 = scmp.lt.s32.totalorder %s2972_s30, %s2965_s24 }
  0x84   : > { %p2969_p6 = pneg %p2968_p3  ;;  %p2975_p13 = por %p2974_p11, %p2973_p9 }
  0x86   : > { %p2976_p8 = pnand %p2975_p13, %p2969_p6 }
  0x88   : > { %2979 = shalt.err (!%p2976_p8)
}
  0x89   : > { %2615 = dma.hbm_to_vmem [thread:$0]  (!%p3435_p7), %s309_s16, 2048, %s311_s4, %s3344_s2, %s3731_s3, %s3731_s3, %s3730_s14  }
  0x8a   : > { %s3749_s19 = sld [smem:[#allocation21_spill]] }
  0x90   : > { %p3750_p2 = scmp.ne.s32.totalorder %s3749_s19, 0 }
  0x91   : > { %s324_s27 = sand.u32 (!%p3750_p2), 1, %s3112_s28  }
  0x92   : > { %322 = sbr.rel (%p3750_p2) target bundleno = 815 (0x32f), region = 44  ;;  %s2054_s5 = sshll.u32 (!%p3750_p2), %s324_s27, 8 }
  0x93   : > { %s325_s25 = scalar_lea.sflag (!%p3750_p2), [#allocation4], %s324_s27  ;;  %s3450_s0 = scalar_lea.vmem (!%p3750_p2), [#allocation3], %s2054_s5 }
  0x97   : > { %3063 = dma.done.wait (%p3381_p10), %s325_s25, 4096  }
  0x98   : > { %3065 = vsyncadd (%p3381_p10), %s325_s25, 4294963200  ;;  %s3751_s15 = sld [smem:[#allocation18_spill]]  ;;  %s333_s24 = sand.u32 1, %s3258_s11  }
  0x99   : > { %s3752_s18 = sld [smem:[#allocation25_spill]]  ;;  %s334_s3 = scalar_lea.sflag [#allocation7], %s333_s24 }
  0x9e   : > { %s335_s2 = sand.u32 1, %s3751_s15  }
  0x9f   : > { %s2055_s14 = sshll.u32 %s335_s2, 7  ;;  %p3753_p8 = scmp.ne.s32.totalorder %s3752_s18, 0 }
  0xa0   : > { %s3458_s16 = scalar_lea.vmem [#allocation6], %s2055_s14 }
  0xa1   : > { %3067 = dma.done.wait (%p3753_p8), %s334_s3, 2048  }
  0xa2   : > { %3069 = vsyncadd (%p3753_p8), %s334_s3, 4294965248  ;;  %s344_s4 = sand.u32 1, %s3088_s22  }
  0xa3   : > { %s2056_s13 = sshll.u32 %s344_s4, 7 }
  0xa4   : > { %s3467_s6 = scalar_lea.vmem [#allocation8], %s2056_s13 }
  0xa5   : > { %3071 = dma.done.wait (%p3415_p12), %s334_s3, 2048  }
  0xa6   : > { %3073 = vsyncadd (%p3415_p12), %s334_s3, 4294965248  ;;  %p3754_p10 = scmp.eq.s32.totalorder %s3258_s11, 0 }
  0xa8   : > { %3075 = dma.done.wait (%p3754_p10), [#allocation10], 2048   ;;  %p3755_p4 = pmov %p3754_p10 }
  0xa9   : > { %s3477_s30 = scalar_lea.vmem [#allocation12], %s2056_s13  ;;  %s3756_s19 = sld [smem:[#allocation19_spill]] }
  0xaa   : > { %3077 = vsyncadd (%p3755_p4), [#allocation10], 4294965248 }
  0xaf   : > { %p2060_p7 = scmp.ne.s32.totalorder %s3756_s19, 0 }
  0xb1   : > { %402 = sbr.rel (%p2060_p7) target bundleno = 199 (0xc7), region = 68 }
  0xb6   : > { %v3148_v0 = vmov 0.0  }
  0xb7   : > { %403 = vst [vmem:[#allocation2 + $0xb0] sm:$0xff] %v3148_v0  ;;  %404 = vst [vmem:[#allocation2] sm:$0xff] %v3148_v0 }
  0xb8   : > { %405 = vst [vmem:[#allocation2 + $0xd8] sm:$0xff] %v3148_v0  ;;  %406 = vst [vmem:[#allocation2 + $0x18] sm:$0xff] %v3148_v0 }
  0xb9   : > { %407 = vst [vmem:[#allocation2 + $0x50] sm:$0xff] %v3148_v0  ;;  %408 = vst [vmem:[#allocation2 + $0x68] sm:$0xff] %v3148_v0 }
  0xba   : > { %409 = vst [vmem:[#allocation2 + $0x30] sm:$0xff] %v3148_v0  ;;  %410 = vst [vmem:[#allocation2 + $0x48] sm:$0xff] %v3148_v0 }
  0xbb   : > { %411 = vst [vmem:[#allocation2 + $0x80] sm:$0xff] %v3148_v0  ;;  %412 = vst [vmem:[#allocation2 + $0x88] sm:$0xff] %v3148_v0 }
  0xbc   : > { %413 = vst [vmem:[#allocation2 + $0xe8] sm:$0xff] %v3148_v0  ;;  %414 = vst [vmem:[#allocation2 + $0xb8] sm:$0xff] %v3148_v0 }
  0xbd   : > { %415 = vst [vmem:[#allocation2 + $0x60] sm:$0xff] %v3148_v0  ;;  %416 = vst [vmem:[#allocation2 + $0xf0] sm:$0xff] %v3148_v0 }
  0xbe   : > { %417 = vst [vmem:[#allocation2 + $0x8] sm:$0xff] %v3148_v0  ;;  %418 = vst [vmem:[#allocation2 + $0x78] sm:$0xff] %v3148_v0 }
  0xbf   : > { %419 = vst [vmem:[#allocation2 + $0x38] sm:$0xff] %v3148_v0  ;;  %420 = vst [vmem:[#allocation2 + $0x58] sm:$0xff] %v3148_v0 }
  0xc0   : > { %421 = vst [vmem:[#allocation2 + $0x40] sm:$0xff] %v3148_v0  ;;  %422 = vst [vmem:[#allocation2 + $0xc8] sm:$0xff] %v3148_v0 }
  0xc1   : > { %423 = vst [vmem:[#allocation2 + $0xe0] sm:$0xff] %v3148_v0  ;;  %424 = vst [vmem:[#allocation2 + $0x90] sm:$0xff] %v3148_v0 }
  0xc2   : > { %425 = vst [vmem:[#allocation2 + $0x70] sm:$0xff] %v3148_v0  ;;  %426 = vst [vmem:[#allocation2 + $0xc0] sm:$0xff] %v3148_v0 }
  0xc3   : > { %427 = vst [vmem:[#allocation2 + $0xa8] sm:$0xff] %v3148_v0  ;;  %428 = vst [vmem:[#allocation2 + $0xd0] sm:$0xff] %v3148_v0 }
  0xc4   : > { %429 = vst [vmem:[#allocation2 + $0x10] sm:$0xff] %v3148_v0  ;;  %430 = vst [vmem:[#allocation2 + $0x28] sm:$0xff] %v3148_v0 }
  0xc5   : > { %431 = vst [vmem:[#allocation2 + $0xa0] sm:$0xff] %v3148_v0  ;;  %432 = vst [vmem:[#allocation2 + $0xf8] sm:$0xff] %v3148_v0 }
  0xc6   : > { %433 = vst [vmem:[#allocation2 + $0x20] sm:$0xff] %v3148_v0  ;;  %434 = vst [vmem:[#allocation2 + $0x98] sm:$0xff] %v3148_v0 }
  0xc7 PF: > { %v2748_v1 = vld [vmem:[%s3458_s16 + $0x78] sm:$0xff]   ;;  %v2750_v3 = vld [vmem:[%s3458_s16 + $0x70] sm:$0xff]   ;;  %v2752_v5 = vld [vmem:[%s3458_s16 + $0x68] sm:$0xff]   ;;  %s3757_s11 = sld [smem:[#allocation19_spill]] }
  0xc8   : > { %v2749_v2 = vld [vmem:[%s3458_s16 + $0x38] sm:$0xff]   ;;  %2311 = vmatprep.subr.bf16.mxu0 %v2748_v1  ;;  %2567 = vmatprep.subr.bf16.mxu1 %v2748_v1  ;;  %v2751_v4 = vld [vmem:[%s3458_s16 + $0x30] sm:$0xff]   ;;  %v2753_v6 = vld [vmem:[%s3458_s16 + $0x28] sm:$0xff]  }
  0xc9   : > { %2312 = vmatpush3.bf16.msra.mxu0 %v2749_v2  ;;  %2575 = vmatpush3.bf16.msra.mxu1 %v2749_v2  ;;  %v2754_v7 = vld [vmem:[%s3458_s16 + $0x60] sm:$0xff]   ;;  %v2756_v9 = vld [vmem:[%s3458_s16 + $0x58] sm:$0xff]   ;;  %v2758_v11 = vld [vmem:[%s3458_s16 + $0x50] sm:$0xff]  }
  0xca   : > { %2313 = vmatprep.subr.bf16.mxu0 %v2750_v3  ;;  %2568 = vmatprep.subr.bf16.mxu1 %v2750_v3  ;;  %v2755_v8 = vld [vmem:[%s3458_s16 + $0x20] sm:$0xff]   ;;  %v2757_v10 = vld [vmem:[%s3458_s16 + $0x18] sm:$0xff]   ;;  %v2759_v14 = vld [vmem:[%s3458_s16 + $0x10] sm:$0xff]  }
  0xcb   : > { %v2766_v12 = vld [vmem:[%s3450_s0 + $0x4] ss:$8 sps:$4 sm:$0xff]   ;;  %v2764_v19 = vld [vmem:[%s3450_s0] ss:$8 sps:$4 sm:$0xff]   ;;  %v2770_v21 = vld [vmem:[%s3450_s0 + $0x14] ss:$8 sps:$4 sm:$0xff]  }
  0xcc   : > { %v2769_v13 = vld [vmem:[%s3450_s0 + $0x84] ss:$8 sps:$4 sm:$0xff]   ;;  %819 = vmatprep.mubr.bf16.mxu0 %v2766_v12  ;;  %v2767_v20 = vld [vmem:[%s3450_s0 + $0x80] ss:$8 sps:$4 sm:$0xff]   ;;  %v2772_v22 = vld [vmem:[%s3450_s0 + $0x94] ss:$8 sps:$4 sm:$0xff]  }
  0xcd   : > { %2314 = vmatpush3.bf16.msra.mxu0 %v2751_v4  ;;  %2576 = vmatpush3.bf16.msra.mxu1 %v2751_v4  ;;  %v2760_v15 = vld [vmem:[%s3458_s16 + $0x48] sm:$0xff]   ;;  %v2762_v17 = vld [vmem:[%s3458_s16 + $0x40] sm:$0xff]   ;;  %v2774_v23 = vld [vmem:[%s3450_s0 + $0x10] ss:$8 sps:$4 sm:$0xff]   ;;  %p2109_p12 = scmp.ne.s32.totalorder %s3757_s11, 1 }
  0xce   : > { %2315 = vmatprep.subr.bf16.mxu0 %v2752_v5  ;;  %2569 = vmatprep.subr.bf16.mxu1 %v2752_v5  ;;  %v2761_v16 = vld [vmem:[%s3458_s16 + $0x8] sm:$0xff]   ;;  %v2763_v18 = vld [vmem:[%s3458_s16] sm:$0xff]   ;;  %v2775_v24 = vld [vmem:[%s3450_s0 + $0x90] ss:$8 sps:$4 sm:$0xff]   ;;  %s3758_s5 = sld [smem:[#allocation31_spill]] (!%p2109_p12) }
  0xcf   : > { %883 = vmatprep.mubr.bf16.mxu1 %v2769_v13  ;;  %v2776_v25 = vld [vmem:[%s3450_s0 + $0x24] ss:$8 sps:$4 sm:$0xff]   ;;  %v2780_v27 = vld [vmem:[%s3450_s0 + $0x20] ss:$8 sps:$4 sm:$0xff]   ;;  %v2782_v29 = vld [vmem:[%s3450_s0 + $0x34] ss:$8 sps:$4 sm:$0xff]  }
  0xd0   : > { %v2778_v26 = vld [vmem:[%s3450_s0 + $0xa4] ss:$8 sps:$4 sm:$0xff]   ;;  %v2781_v28 = vld [vmem:[%s3450_s0 + $0xa0] ss:$8 sps:$4 sm:$0xff]   ;;  %v2784_v30 = vld [vmem:[%s3450_s0 + $0xb4] ss:$8 sps:$4 sm:$0xff]  }
  0xd1   : > { %2316 = vmatpush3.bf16.msra.mxu0 %v2753_v6  ;;  %2577 = vmatpush3.bf16.msra.mxu1 %v2753_v6  ;;  %v2786_v31 = vld [vmem:[%s3450_s0 + $0x30] ss:$8 sps:$4 sm:$0xff]   ;;  %v2788_v33 = vld [vmem:[%s3450_s0 + $0x44] ss:$8 sps:$4 sm:$0xff]   ;;  %v2792_v35 = vld [vmem:[%s3450_s0 + $0x40] ss:$8 sps:$4 sm:$0xff]  }
  0xd2   : > { %2317 = vmatprep.subr.bf16.mxu0 %v2754_v7  ;;  %2570 = vmatprep.subr.bf16.mxu1 %v2754_v7  ;;  %v2787_v32 = vld [vmem:[%s3450_s0 + $0xb0] ss:$8 sps:$4 sm:$0xff]   ;;  %v2790_v34 = vld [vmem:[%s3450_s0 + $0xc4] ss:$8 sps:$4 sm:$0xff]   ;;  %v2793_v36 = vld [vmem:[%s3450_s0 + $0xc0] ss:$8 sps:$4 sm:$0xff]  }
  0xd3   : > { %v2794_v37 = vld [vmem:[%s3450_s0 + $0x54] ss:$8 sps:$4 sm:$0xff]   ;;  %v2798_v39 = vld [vmem:[%s3450_s0 + $0x50] ss:$8 sps:$4 sm:$0xff]   ;;  %v2800_v41 = vld [vmem:[%s3450_s0 + $0x64] ss:$8 sps:$4 sm:$0xff]  }
  0xd4   : > { %v2796_v38 = vld [vmem:[%s3450_s0 + $0xd4] ss:$8 sps:$4 sm:$0xff]   ;;  %v2799_v40 = vld [vmem:[%s3450_s0 + $0xd0] ss:$8 sps:$4 sm:$0xff]   ;;  %v2802_v42 = vld [vmem:[%s3450_s0 + $0xe4] ss:$8 sps:$4 sm:$0xff]  }
  0xd5   : > { %2318 = vmatpush3.bf16.msra.mxu0 %v2755_v8  ;;  %2578 = vmatpush3.bf16.msra.mxu1 %v2755_v8  ;;  %v2804_v43 = vld [vmem:[%s3450_s0 + $0x60] ss:$8 sps:$4 sm:$0xff]   ;;  %v2806_v45 = vld [vmem:[%s3450_s0 + $0x74] ss:$8 sps:$4 sm:$0xff]   ;;  %v2810_v47 = vld [vmem:[%s3450_s0 + $0x70] ss:$8 sps:$4 sm:$0xff]  }
  0xd6   : > { %2319 = vmatprep.subr.bf16.mxu0 %v2756_v9  ;;  %2571 = vmatprep.subr.bf16.mxu1 %v2756_v9  ;;  %v2805_v44 = vld [vmem:[%s3450_s0 + $0xe0] ss:$8 sps:$4 sm:$0xff]   ;;  %v2808_v46 = vld [vmem:[%s3450_s0 + $0xf4] ss:$8 sps:$4 sm:$0xff]   ;;  %v2811_v48 = vld [vmem:[%s3450_s0 + $0xf0] ss:$8 sps:$4 sm:$0xff]  }
  0xd7   : > { %v435_v51 = vld [vmem:[#allocation2 + $0xb0] sm:$0xff]  ;;  %v451_v53 = vld [vmem:[#allocation2 + $0x38] sm:$0xff]  ;;  %v436_v61 = vld [vmem:[#allocation2] sm:$0xff] }
  0xd8   : > { %v452_v63 = vld [vmem:[#allocation2 + $0x58] sm:$0xff]  ;;  %v453_v9 = vld [vmem:[#allocation2 + $0x40] sm:$0xff] }
  0xd9   : > { %2320 = vmatpush3.bf16.msra.mxu0 %v2757_v10  ;;  %2579 = vmatpush3.bf16.msra.mxu1 %v2757_v10  ;;  %v437_v7 = vld [vmem:[#allocation2 + $0xd8] sm:$0xff] }
  0xda   : > { %2321 = vmatprep.subr.bf16.mxu0 %v2758_v11  ;;  %2572 = vmatprep.subr.bf16.mxu1 %v2758_v11 }
  0xdd   : > { %2322 = vmatpush3.bf16.msra.mxu0 %v2759_v14  ;;  %2580 = vmatpush3.bf16.msra.mxu1 %v2759_v14 }
  0xde   : > { %2323 = vmatprep.subr.bf16.mxu0 %v2760_v15  ;;  %2573 = vmatprep.subr.bf16.mxu1 %v2760_v15 }
  0xe1   : > { %2324 = vmatpush3.bf16.msra.mxu0 %v2761_v16  ;;  %2581 = vmatpush3.bf16.msra.mxu1 %v2761_v16 }
  0xe2   : > { %2325 = vmatprep.subr.bf16.mxu0 %v2762_v17  ;;  %2574 = vmatprep.subr.bf16.mxu1 %v2762_v17  ;;  %v438_v17 = vld [vmem:[#allocation2 + $0x18] sm:$0xff] }
  0xe5   : > { %2326 = vmatpush3.bf16.msra.mxu0 %v2763_v18  ;;  %2582 = vmatpush3.bf16.msra.mxu1 %v2763_v18 }
  0xe8   : > { %820 = vmatmul.mubr.bf16.vlgmr.msra.gmra.mxu0 %v2764_v19  ;;  %884 = vmatmul.mubr.bf16.vlgmr.msra.gmra.mxu1 %v2767_v20  ;;  %v454_v19 = vld [vmem:[#allocation2 + $0xc8] sm:$0xff] }
  0xe9   : > { %827 = vmatprep.mubr.bf16.mxu0 %v2770_v21  ;;  %891 = vmatprep.mubr.bf16.mxu1 %v2772_v22 }
  0xf0   : > { %828 = vmatmul.mubr.bf16.gmra.mxu0 %v2774_v23  ;;  %892 = vmatmul.mubr.bf16.gmra.mxu1 %v2775_v24 }
  0xf1   : > { %835 = vmatprep.mubr.bf16.mxu0 %v2776_v25  ;;  %899 = vmatprep.mubr.bf16.mxu1 %v2778_v26 }
  0xf8   : > { %836 = vmatmul.mubr.bf16.gmra.mxu0 %v2780_v27  ;;  %900 = vmatmul.mubr.bf16.gmra.mxu1 %v2781_v28  ;;  %v439_v27 = vld [vmem:[#allocation2 + $0x50] sm:$0xff] }
  0xf9   : > { %843 = vmatprep.mubr.bf16.mxu0 %v2782_v29  ;;  %907 = vmatprep.mubr.bf16.mxu1 %v2784_v30  ;;  %v455_v29 = vld [vmem:[#allocation2 + $0xe0] sm:$0xff] }
 0x100   : > { %844 = vmatmul.mubr.bf16.gmra.mxu0 %v2786_v31  ;;  %908 = vmatmul.mubr.bf16.gmra.mxu1 %v2787_v32 }
 0x101   : > { %851 = vmatprep.mubr.bf16.mxu0 %v2788_v33  ;;  %915 = vmatprep.mubr.bf16.mxu1 %v2790_v34 }
 0x108   : > { %852 = vmatmul.mubr.bf16.gmra.mxu0 %v2792_v35  ;;  %916 = vmatmul.mubr.bf16.gmra.mxu1 %v2793_v36 }
 0x109   : > { %859 = vmatprep.mubr.bf16.mxu0 %v2794_v37  ;;  %923 = vmatprep.mubr.bf16.mxu1 %v2796_v38  ;;  %v440_v37 = vld [vmem:[#allocation2 + $0x68] sm:$0xff] }
 0x110   : > { %860 = vmatmul.mubr.bf16.gmra.mxu0 %v2798_v39  ;;  %924 = vmatmul.mubr.bf16.gmra.mxu1 %v2799_v40  ;;  %v456_v39 = vld [vmem:[#allocation2 + $0x90] sm:$0xff] }
 0x111   : > { %867 = vmatprep.mubr.bf16.mxu0 %v2800_v41  ;;  %931 = vmatprep.mubr.bf16.mxu1 %v2802_v42 }
 0x118   : > { %868 = vmatmul.mubr.bf16.gmra.mxu0 %v2804_v43  ;;  %932 = vmatmul.mubr.bf16.gmra.mxu1 %v2805_v44 }
 0x119   : > { %875 = vmatprep.mubr.bf16.mxu0 %v2806_v45  ;;  %939 = vmatprep.mubr.bf16.mxu1 %v2808_v46 }
 0x120   : > { %876 = vmatmul.mubr.bf16.gmra.mxu0 %v2810_v47  ;;  %940 = vmatmul.mubr.bf16.gmra.mxu1 %v2811_v48  ;;  %v441_v47 = vld [vmem:[#allocation2 + $0x30] sm:$0xff] }
 0x1a8   : > { %v2327_v49 = vpop.f32.mrf.mxu0  ;;  %v2375_v50 = vpop.f32.mrf.mxu1 }
 0x1aa   : > { %v2328_v52 = vpop.f32.mrf.mxu0  ;;  %v2376_v54 = vpop.f32.mrf.mxu1 }
 0x1ab   : > { %v2329_v55 = vadd.f32 %v2328_v52, %v2327_v49  ;;  %v2377_v56 = vadd.f32 %v2376_v54, %v2375_v50  ;;  %v457_v49 = vld [vmem:[#allocation2 + $0x70] sm:$0xff] }
 0x1ac   : > { %v2330_v57 = vpop.f32.mrf.mxu0  ;;  %v2378_v58 = vpop.f32.mrf.mxu1 }
 0x1ad   : > { %v948_v59 = vadd.f32 %v2329_v55, %v435_v51  ;;  %v964_v60 = vadd.f32 %v2377_v56, %v451_v53 }
 0x1ae   : > { %v2331_v62 = vpop.f32.mrf.mxu0  ;;  %v2379_v0 = vpop.f32.mrf.mxu1 }
 0x1af   : > { %980 = vst [vmem:[#allocation2 + $0xb0] sm:$0xff] %v948_v59  ;;  %996 = vst [vmem:[#allocation2 + $0x38] sm:$0xff] %v964_v60  ;;  %v2332_v1 = vadd.f32 %v2331_v62, %v2330_v57  ;;  %v2380_v2 = vadd.f32 %v2379_v0, %v2378_v58  ;;  %v442_v57 = vld [vmem:[#allocation2 + $0x48] sm:$0xff]  ;;  %v458_v59 = vld [vmem:[#allocation2 + $0xc0] sm:$0xff] }
 0x1b0   : > { %v2333_v3 = vpop.f32.mrf.mxu0  ;;  %v2381_v4 = vpop.f32.mrf.mxu1 }
 0x1b1   : > { %v949_v5 = vadd.f32 %v2332_v1, %v436_v61  ;;  %v965_v6 = vadd.f32 %v2380_v2, %v452_v63 }
 0x1b2   : > { %v2334_v8 = vpop.f32.mrf.mxu0  ;;  %v2382_v10 = vpop.f32.mrf.mxu1 }
 0x1b3   : > { %981 = vst [vmem:[#allocation2] sm:$0xff] %v949_v5  ;;  %997 = vst [vmem:[#allocation2 + $0x58] sm:$0xff] %v965_v6  ;;  %v2335_v11 = vadd.f32 %v2334_v8, %v2333_v3  ;;  %v2383_v12 = vadd.f32 %v2382_v10, %v2381_v4  ;;  %v443_v3 = vld [vmem:[#allocation2 + $0x80] sm:$0xff]  ;;  %v459_v5 = vld [vmem:[#allocation2 + $0xa8] sm:$0xff] }
 0x1b4   : > { %v2336_v13 = vpop.f32.mrf.mxu0  ;;  %v2384_v14 = vpop.f32.mrf.mxu1 }
 0x1b5   : > { %v950_v15 = vadd.f32 %v2335_v11, %v437_v7  ;;  %v966_v16 = vadd.f32 %v2383_v12, %v453_v9 }
 0x1b6   : > { %v2337_v18 = vpop.f32.mrf.mxu0  ;;  %v2385_v20 = vpop.f32.mrf.mxu1 }
 0x1b7   : > { %982 = vst [vmem:[#allocation2 + $0xd8] sm:$0xff] %v950_v15  ;;  %998 = vst [vmem:[#allocation2 + $0x40] sm:$0xff] %v966_v16  ;;  %v2338_v21 = vadd.f32 %v2337_v18, %v2336_v13  ;;  %v2386_v22 = vadd.f32 %v2385_v20, %v2384_v14  ;;  %v444_v13 = vld [vmem:[#allocation2 + $0x88] sm:$0xff]  ;;  %v460_v15 = vld [vmem:[#allocation2 + $0xd0] sm:$0xff] }
 0x1b8   : > { %v2339_v23 = vpop.f32.mrf.mxu0  ;;  %v2387_v24 = vpop.f32.mrf.mxu1 }
 0x1b9   : > { %v951_v25 = vadd.f32 %v2338_v21, %v438_v17  ;;  %v967_v26 = vadd.f32 %v2386_v22, %v454_v19 }
 0x1ba   : > { %v2340_v28 = vpop.f32.mrf.mxu0  ;;  %v2388_v30 = vpop.f32.mrf.mxu1 }
 0x1bb   : > { %983 = vst [vmem:[#allocation2 + $0x18] sm:$0xff] %v951_v25  ;;  %999 = vst [vmem:[#allocation2 + $0xc8] sm:$0xff] %v967_v26  ;;  %v2341_v31 = vadd.f32 %v2340_v28, %v2339_v23  ;;  %v2389_v32 = vadd.f32 %v2388_v30, %v2387_v24  ;;  %v445_v23 = vld [vmem:[#allocation2 + $0xe8] sm:$0xff]  ;;  %v461_v25 = vld [vmem:[#allocation2 + $0x10] sm:$0xff] }
 0x1bc   : > { %v2342_v33 = vpop.f32.mrf.mxu0  ;;  %v2390_v34 = vpop.f32.mrf.mxu1 }
 0x1bd   : > { %v952_v35 = vadd.f32 %v2341_v31, %v439_v27  ;;  %v968_v36 = vadd.f32 %v2389_v32, %v455_v29 }
 0x1be   : > { %v2343_v38 = vpop.f32.mrf.mxu0  ;;  %v2391_v40 = vpop.f32.mrf.mxu1 }
 0x1bf   : > { %984 = vst [vmem:[#allocation2 + $0x50] sm:$0xff] %v952_v35  ;;  %1000 = vst [vmem:[#allocation2 + $0xe0] sm:$0xff] %v968_v36  ;;  %v2344_v41 = vadd.f32 %v2343_v38, %v2342_v33  ;;  %v2392_v42 = vadd.f32 %v2391_v40, %v2390_v34  ;;  %v446_v33 = vld [vmem:[#allocation2 + $0xb8] sm:$0xff]  ;;  %v462_v35 = vld [vmem:[#allocation2 + $0x28] sm:$0xff] }
 0x1c0   : > { %v2345_v43 = vpop.f32.mrf.mxu0  ;;  %v2393_v44 = vpop.f32.mrf.mxu1 }
 0x1c1   : > { %v953_v45 = vadd.f32 %v2344_v41, %v440_v37  ;;  %v969_v46 = vadd.f32 %v2392_v42, %v456_v39 }
 0x1c2   : > { %v2346_v48 = vpop.f32.mrf.mxu0  ;;  %v2394_v50 = vpop.f32.mrf.mxu1 }
 0x1c3   : > { %985 = vst [vmem:[#allocation2 + $0x68] sm:$0xff] %v953_v45  ;;  %1001 = vst [vmem:[#allocation2 + $0x90] sm:$0xff] %v969_v46  ;;  %v2347_v51 = vadd.f32 %v2346_v48, %v2345_v43  ;;  %v2395_v52 = vadd.f32 %v2394_v50, %v2393_v44  ;;  %v447_v43 = vld [vmem:[#allocation2 + $0x60] sm:$0xff] }
 0x1c4   : > { %v2348_v53 = vpop.f32.mrf.mxu0  ;;  %v2396_v54 = vpop.f32.mrf.mxu1  ;;  %v463_v45 = vld [vmem:[#allocation2 + $0xa0] sm:$0xff] }
 0x1c5   : > { %v954_v55 = vadd.f32 %v2347_v51, %v441_v47  ;;  %v970_v56 = vadd.f32 %v2395_v52, %v457_v49 }
 0x1c6   : > { %v2349_v58 = vpop.f32.mrf.mxu0  ;;  %v2397_v60 = vpop.f32.mrf.mxu1 }
 0x1c7   : > { %986 = vst [vmem:[#allocation2 + $0x30] sm:$0xff] %v954_v55  ;;  %1002 = vst [vmem:[#allocation2 + $0x70] sm:$0xff] %v970_v56  ;;  %v2350_v61 = vadd.f32 %v2349_v58, %v2348_v53  ;;  %v2398_v62 = vadd.f32 %v2397_v60, %v2396_v54  ;;  %v448_v53 = vld [vmem:[#allocation2 + $0xf0] sm:$0xff]  ;;  %v464_v55 = vld [vmem:[#allocation2 + $0xf8] sm:$0xff] }
 0x1c8   : > { %v2351_v63 = vpop.f32.mrf.mxu0  ;;  %v2399_v0 = vpop.f32.mrf.mxu1 }
 0x1c9   : > { %v955_v1 = vadd.f32 %v2350_v61, %v442_v57  ;;  %v971_v2 = vadd.f32 %v2398_v62, %v458_v59 }
 0x1ca   : > { %v2352_v4 = vpop.f32.mrf.mxu0  ;;  %v2400_v6 = vpop.f32.mrf.mxu1 }
 0x1cb   : > { %987 = vst [vmem:[#allocation2 + $0x48] sm:$0xff] %v955_v1  ;;  %1003 = vst [vmem:[#allocation2 + $0xc0] sm:$0xff] %v971_v2  ;;  %v2353_v7 = vadd.f32 %v2352_v4, %v2351_v63  ;;  %v2401_v8 = vadd.f32 %v2400_v6, %v2399_v0  ;;  %v449_v63 = vld [vmem:[#allocation2 + $0x8] sm:$0xff]  ;;  %v465_v1 = vld [vmem:[#allocation2 + $0x20] sm:$0xff] }
 0x1cc   : > { %v2354_v9 = vpop.f32.mrf.mxu0  ;;  %v2402_v10 = vpop.f32.mrf.mxu1 }
 0x1cd   : > { %v956_v11 = vadd.f32 %v2353_v7, %v443_v3  ;;  %v972_v12 = vadd.f32 %v2401_v8, %v459_v5 }
 0x1ce   : > { %v2355_v14 = vpop.f32.mrf.mxu0  ;;  %v2403_v16 = vpop.f32.mrf.mxu1 }
 0x1cf   : > { %988 = vst [vmem:[#allocation2 + $0x80] sm:$0xff] %v956_v11  ;;  %1004 = vst [vmem:[#allocation2 + $0xa8] sm:$0xff] %v972_v12  ;;  %v2356_v17 = vadd.f32 %v2355_v14, %v2354_v9  ;;  %v2404_v18 = vadd.f32 %v2403_v16, %v2402_v10  ;;  %v450_v9 = vld [vmem:[#allocation2 + $0x78] sm:$0xff] }
 0x1d0   : > { %v2357_v19 = vpop.f32.mrf.mxu0  ;;  %v2405_v20 = vpop.f32.mrf.mxu1  ;;  %v466_v11 = vld [vmem:[#allocation2 + $0x98] sm:$0xff] }
 0x1d1   : > { %v957_v21 = vadd.f32 %v2356_v17, %v444_v13  ;;  %v973_v22 = vadd.f32 %v2404_v18, %v460_v15 }
 0x1d2   : > { %v2358_v24 = vpop.f32.mrf.mxu0  ;;  %v2406_v26 = vpop.f32.mrf.mxu1 }
 0x1d3   : > { %989 = vst [vmem:[#allocation2 + $0x88] sm:$0xff] %v957_v21  ;;  %1005 = vst [vmem:[#allocation2 + $0xd0] sm:$0xff] %v973_v22  ;;  %v2359_v27 = vadd.f32 %v2358_v24, %v2357_v19  ;;  %v2407_v28 = vadd.f32 %v2406_v26, %v2405_v20 }
 0x1d4   : > { %v2360_v29 = vpop.f32.mrf.mxu0  ;;  %v2408_v30 = vpop.f32.mrf.mxu1 }
 0x1d5   : > { %v958_v31 = vadd.f32 %v2359_v27, %v445_v23  ;;  %v974_v32 = vadd.f32 %v2407_v28, %v461_v25 }
 0x1d6   : > { %v2361_v34 = vpop.f32.mrf.mxu0  ;;  %v2409_v36 = vpop.f32.mrf.mxu1 }
 0x1d7   : > { %990 = vst [vmem:[#allocation2 + $0xe8] sm:$0xff] %v958_v31  ;;  %1006 = vst [vmem:[#allocation2 + $0x10] sm:$0xff] %v974_v32  ;;  %v2362_v37 = vadd.f32 %v2361_v34, %v2360_v29  ;;  %v2410_v38 = vadd.f32 %v2409_v36, %v2408_v30 }
 0x1d8   : > { %v2363_v39 = vpop.f32.mrf.mxu0  ;;  %v2411_v40 = vpop.f32.mrf.mxu1 }
 0x1d9   : > { %v959_v41 = vadd.f32 %v2362_v37, %v446_v33  ;;  %v975_v42 = vadd.f32 %v2410_v38, %v462_v35 }
 0x1da   : > { %v2364_v44 = vpop.f32.mrf.mxu0  ;;  %v2412_v46 = vpop.f32.mrf.mxu1 }
 0x1db   : > { %991 = vst [vmem:[#allocation2 + $0xb8] sm:$0xff] %v959_v41  ;;  %1007 = vst [vmem:[#allocation2 + $0x28] sm:$0xff] %v975_v42  ;;  %v2365_v47 = vadd.f32 %v2364_v44, %v2363_v39  ;;  %v2413_v48 = vadd.f32 %v2412_v46, %v2411_v40 }
 0x1dc   : > { %v2366_v49 = vpop.f32.mrf.mxu0  ;;  %v2414_v50 = vpop.f32.mrf.mxu1 }
 0x1dd   : > { %v960_v51 = vadd.f32 %v2365_v47, %v447_v43  ;;  %v976_v52 = vadd.f32 %v2413_v48, %v463_v45 }
 0x1de   : > { %v2367_v54 = vpop.f32.mrf.mxu0  ;;  %v2415_v56 = vpop.f32.mrf.mxu1 }
 0x1df   : > { %992 = vst [vmem:[#allocation2 + $0x60] sm:$0xff] %v960_v51  ;;  %1008 = vst [vmem:[#allocation2 + $0xa0] sm:$0xff] %v976_v52  ;;  %v2368_v57 = vadd.f32 %v2367_v54, %v2366_v49  ;;  %v2416_v58 = vadd.f32 %v2415_v56, %v2414_v50 }
 0x1e0   : > { %v2369_v59 = vpop.f32.mrf.mxu0  ;;  %v2417_v60 = vpop.f32.mrf.mxu1 }
 0x1e1   : > { %v961_v61 = vadd.f32 %v2368_v57, %v448_v53  ;;  %v977_v62 = vadd.f32 %v2416_v58, %v464_v55 }
 0x1e2   : > { %v2370_v0 = vpop.f32.mrf.mxu0  ;;  %v2418_v2 = vpop.f32.mrf.mxu1 }
 0x1e3   : > { %993 = vst [vmem:[#allocation2 + $0xf0] sm:$0xff] %v961_v61  ;;  %1009 = vst [vmem:[#allocation2 + $0xf8] sm:$0xff] %v977_v62  ;;  %v2371_v3 = vadd.f32 %v2370_v0, %v2369_v59  ;;  %v2419_v4 = vadd.f32 %v2418_v2, %v2417_v60 }
 0x1e4   : > { %v2372_v5 = vpop.f32.mrf.mxu0  ;;  %v2420_v6 = vpop.f32.mrf.mxu1 }
 0x1e5   : > { %v962_v7 = vadd.f32 %v2371_v3, %v449_v63  ;;  %v978_v8 = vadd.f32 %v2419_v4, %v465_v1 }
 0x1e6   : > { %v2373_v10 = vpop.f32.mrf.mxu0  ;;  %v2421_v12 = vpop.f32.mrf.mxu1 }
 0x1e7   : > { %994 = vst [vmem:[#allocation2 + $0x8] sm:$0xff] %v962_v7  ;;  %1010 = vst [vmem:[#allocation2 + $0x20] sm:$0xff] %v978_v8  ;;  %v2374_v13 = vadd.f32 %v2373_v10, %v2372_v5  ;;  %v2422_v14 = vadd.f32 %v2421_v12, %v2420_v6  ;;  %1015 = sbr.rel (%p2109_p12) target bundleno = 790 (0x316), region = 72 }
 0x1e9   : > { %v963_v15 = vadd.f32 %v2374_v13, %v450_v9  ;;  %v979_v16 = vadd.f32 %v2422_v14, %v466_v11 }
 0x1eb   : > { %995 = vst [vmem:[#allocation2 + $0x78] sm:$0xff] %v963_v15  ;;  %1011 = vst [vmem:[#allocation2 + $0x98] sm:$0xff] %v979_v16 }
 0x1ec   : > { %v2812_v17 = vld [vmem:[#allocation11 + $0x38] sm:$0xff]   ;;  %v2814_v19 = vld [vmem:[#allocation11 + $0x30] sm:$0xff]   ;;  %v2816_v21 = vld [vmem:[#allocation11 + $0x28] sm:$0xff]  }
 0x1ed   : > { %v2813_v18 = vld [vmem:[#allocation9 + $0x38] sm:$0xff]   ;;  %2471 = vmatprep.subr.bf16.mxu0 %v2812_v17  ;;  %v2815_v20 = vld [vmem:[#allocation9 + $0x30] sm:$0xff]   ;;  %v2817_v22 = vld [vmem:[#allocation9 + $0x28] sm:$0xff]  }
 0x1ee   : > { %2519 = vmatprep.subr.bf16.mxu1 %v2813_v18  ;;  %2472 = vmatpush3.bf16.msra.mxu0 %v2812_v17  ;;  %v2818_v23 = vld [vmem:[#allocation11 + $0x20] sm:$0xff]   ;;  %v2820_v25 = vld [vmem:[#allocation11 + $0x18] sm:$0xff]   ;;  %v2822_v27 = vld [vmem:[#allocation11 + $0x10] sm:$0xff]  }
 0x1ef   : > { %2520 = vmatpush3.bf16.msra.mxu1 %v2813_v18  ;;  %2473 = vmatprep.subr.bf16.mxu0 %v2814_v19  ;;  %v2819_v24 = vld [vmem:[#allocation9 + $0x20] sm:$0xff]   ;;  %v2821_v26 = vld [vmem:[#allocation9 + $0x18] sm:$0xff]   ;;  %v2823_v28 = vld [vmem:[#allocation9 + $0x10] sm:$0xff]  }
 0x1f0   : > { %2521 = vmatprep.subr.bf16.mxu1 %v2815_v20  ;;  %v2828_v29 = vld [vmem:[%s3467_s6] sm:$0xff]   ;;  %v1016_v30 = vld [vmem:[#allocation2 + $0xb0] sm:$0xff]  ;;  %v2824_v33 = vld [vmem:[#allocation11 + $0x8] sm:$0xff]  }
 0x1f1   : > { %v1017_v31 = vld [vmem:[#allocation2] sm:$0xff]  ;;  %2487 = vmatprep.mubr.bf16.mxu0 %v2828_v29  ;;  %v2825_v34 = vld [vmem:[#allocation9 + $0x8] sm:$0xff]   ;;  %v1018_v37 = vld [vmem:[#allocation2 + $0xd8] sm:$0xff] }
 0x1f2   : > { %2474 = vmatpush3.bf16.msra.mxu0 %v2814_v19  ;;  %v1048_v32 = vpack.c.bf16 %v1017_v31, %v1016_v30  ;;  %v2826_v35 = vld [vmem:[#allocation11] sm:$0xff]   ;;  %v1019_v38 = vld [vmem:[#allocation2 + $0x18] sm:$0xff]  ;;  %v1020_v39 = vld [vmem:[#allocation2 + $0x50] sm:$0xff] }
 0x1f3   : > { %2522 = vmatpush3.bf16.msra.mxu1 %v2815_v20  ;;  %2475 = vmatprep.subr.bf16.mxu0 %v2816_v21  ;;  %v2827_v36 = vld [vmem:[#allocation9] sm:$0xff]   ;;  %v1021_v40 = vld [vmem:[#allocation2 + $0x68] sm:$0xff]  ;;  %v1049_v42 = vpack.c.bf16 %v1019_v38, %v1018_v37  ;;  %v2830_v43 = vld [vmem:[%s3467_s6 + $0x10] sm:$0xff]  }
 0x1f4   : > { %2523 = vmatprep.subr.bf16.mxu1 %v2817_v22  ;;  %2535 = vmatprep.mubr.bf16.mxu1 %v1048_v32  ;;  %v2829_v41 = vld [vmem:[%s3467_s6 + $0x8] sm:$0xff]   ;;  %v1050_v44 = vpack.c.bf16 %v1021_v40, %v1020_v39  ;;  %v1022_v45 = vld [vmem:[#allocation2 + $0x30] sm:$0xff]  ;;  %v1024_v47 = vld [vmem:[#allocation2 + $0x80] sm:$0xff] }
 0x1f5   : > { %v1023_v46 = vld [vmem:[#allocation2 + $0x48] sm:$0xff]  ;;  %v2831_v49 = vld [vmem:[%s3467_s6 + $0x18] sm:$0xff]   ;;  %v2832_v51 = vld [vmem:[%s3467_s6 + $0x20] sm:$0xff]  }
 0x1f6   : > { %2476 = vmatpush3.bf16.msra.mxu0 %v2816_v21  ;;  %v1025_v48 = vld [vmem:[#allocation2 + $0x88] sm:$0xff]  ;;  %v1051_v50 = vpack.c.bf16 %v1023_v46, %v1022_v45  ;;  %v1027_v54 = vld [vmem:[#allocation2 + $0xb8] sm:$0xff]  ;;  %v1028_v55 = vld [vmem:[#allocation2 + $0x60] sm:$0xff] }
 0x1f7   : > { %2524 = vmatpush3.bf16.msra.mxu1 %v2817_v22  ;;  %2477 = vmatprep.subr.bf16.mxu0 %v2818_v23  ;;  %v1052_v52 = vpack.c.bf16 %v1025_v48, %v1024_v47  ;;  %v1026_v53 = vld [vmem:[#allocation2 + $0xe8] sm:$0xff]  ;;  %v1029_v56 = vld [vmem:[#allocation2 + $0xf0] sm:$0xff]  ;;  %v1031_v62 = vld [vmem:[#allocation2 + $0x78] sm:$0xff] }
 0x1f8   : > { %2525 = vmatprep.subr.bf16.mxu1 %v2819_v24  ;;  %v2833_v57 = vld [vmem:[%s3467_s6 + $0x28] sm:$0xff]   ;;  %v1053_v58 = vpack.c.bf16 %v1027_v54, %v1026_v53  ;;  %v2834_v59 = vld [vmem:[%s3467_s6 + $0x30] sm:$0xff]   ;;  %v1054_v60 = vpack.c.bf16 %v1029_v56, %v1028_v55  ;;  %v1032_v63 = vld [vmem:[#allocation2 + $0x38] sm:$0xff] }
 0x1f9   : > { %v1030_v61 = vld [vmem:[#allocation2 + $0x8] sm:$0xff]  ;;  %v1033_v0 = vld [vmem:[#allocation2 + $0x58] sm:$0xff]  ;;  %v2836_v3 = vld [vmem:[%s3467_s6 + $0x40] sm:$0xff]  }
 0x1fa   : > { %2478 = vmatpush3.bf16.msra.mxu0 %v2818_v23  ;;  %v2835_v1 = vld [vmem:[%s3467_s6 + $0x38] sm:$0xff]   ;;  %v1055_v2 = vpack.c.bf16 %v1031_v62, %v1030_v61  ;;  %v1056_v4 = vpack.c.bf16 %v1033_v0, %v1032_v63  ;;  %v1034_v5 = vld [vmem:[#allocation2 + $0x40] sm:$0xff]  ;;  %v1035_v6 = vld [vmem:[#allocation2 + $0xc8] sm:$0xff] }
 0x1fb   : > { %2526 = vmatpush3.bf16.msra.mxu1 %v2819_v24  ;;  %2479 = vmatprep.subr.bf16.mxu0 %v2820_v25  ;;  %v1036_v7 = vld [vmem:[#allocation2 + $0xe0] sm:$0xff]  ;;  %v1037_v8 = vld [vmem:[#allocation2 + $0x90] sm:$0xff]  ;;  %v2837_v9 = vld [vmem:[%s3467_s6 + $0x48] sm:$0xff]   ;;  %v1057_v10 = vpack.c.bf16 %v1035_v6, %v1034_v5 }
 0x1fc   : > { %2527 = vmatprep.subr.bf16.mxu1 %v2821_v26  ;;  %v2838_v11 = vld [vmem:[%s3467_s6 + $0x50] sm:$0xff]   ;;  %v1058_v12 = vpack.c.bf16 %v1037_v8, %v1036_v7  ;;  %v1039_v14 = vld [vmem:[#allocation2 + $0xc0] sm:$0xff]  ;;  %v1040_v15 = vld [vmem:[#allocation2 + $0xa8] sm:$0xff] }
 0x1fd   : > { %v1038_v13 = vld [vmem:[#allocation2 + $0x70] sm:$0xff]  ;;  %v2839_v17 = vld [vmem:[%s3467_s6 + $0x58] sm:$0xff]   ;;  %v2840_v19 = vld [vmem:[%s3467_s6 + $0x60] sm:$0xff]  }
 0x1fe   : > { %2480 = vmatpush3.bf16.msra.mxu0 %v2820_v25  ;;  %v1041_v16 = vld [vmem:[#allocation2 + $0xd0] sm:$0xff]  ;;  %v1059_v18 = vpack.c.bf16 %v1039_v14, %v1038_v13  ;;  %v1043_v22 = vld [vmem:[#allocation2 + $0x28] sm:$0xff]  ;;  %v1044_v23 = vld [vmem:[#allocation2 + $0xa0] sm:$0xff] }
 0x1ff   : > { %2528 = vmatpush3.bf16.msra.mxu1 %v2821_v26  ;;  %2481 = vmatprep.subr.bf16.mxu0 %v2822_v27  ;;  %v1060_v20 = vpack.c.bf16 %v1041_v16, %v1040_v15  ;;  %v1042_v21 = vld [vmem:[#allocation2 + $0x10] sm:$0xff]  ;;  %v1045_v24 = vld [vmem:[#allocation2 + $0xf8] sm:$0xff]  ;;  %v2841_v25 = vld [vmem:[%s3467_s6 + $0x68] sm:$0xff]  }
 0x200   : > { %2529 = vmatprep.subr.bf16.mxu1 %v2823_v28  ;;  %v1061_v26 = vpack.c.bf16 %v1043_v22, %v1042_v21  ;;  %v1046_v29 = vld [vmem:[#allocation2 + $0x20] sm:$0xff]  ;;  %v1047_v30 = vld [vmem:[#allocation2 + $0x98] sm:$0xff] }
 0x201   : > { %v2843_v31 = vld [vmem:[%s3467_s6 + $0x78] sm:$0xff]   ;;  %v1063_v32 = vpack.c.bf16 %v1047_v30, %v1046_v29  ;;  %v3548_v37 = vld [vmem:[%s3758_s5] ss:$0 sm:$0xff] }
 0x202   : > { %2482 = vmatpush3.bf16.msra.mxu0 %v2822_v27  ;;  %v2842_v27 = vld [vmem:[%s3467_s6 + $0x70] sm:$0xff]  }
 0x203   : > { %2530 = vmatpush3.bf16.msra.mxu1 %v2823_v28  ;;  %2483 = vmatprep.subr.bf16.mxu0 %v2824_v33  ;;  %v1062_v28 = vpack.c.bf16 %v1045_v24, %v1044_v23 }
 0x204   : > { %2531 = vmatprep.subr.bf16.mxu1 %v2825_v34 }
 0x206   : > { %2484 = vmatpush3.bf16.msra.mxu0 %v2824_v33 }
 0x207   : > { %2532 = vmatpush3.bf16.msra.mxu1 %v2825_v34  ;;  %2485 = vmatprep.subr.bf16.mxu0 %v2826_v35 }
 0x208   : > { %2533 = vmatprep.subr.bf16.mxu1 %v2827_v36 }
 0x20a   : > { %2486 = vmatpush3.bf16.msra.mxu0 %v2826_v35 }
 0x20b   : > { %2534 = vmatpush3.bf16.msra.mxu1 %v2827_v36 }
 0x20d   : > { %2488 = vmatmul.mubr.bf16.vlgmr.msra.gmra.mxu0 %v2829_v41 }
 0x20e   : > { %2536 = vmatmul.mubr.bf16.vlgmr.msra.gmra.mxu1 %v1049_v42  ;;  %2491 = vmatprep.mubr.bf16.mxu0 %v2830_v43 }
 0x20f   : > { %2539 = vmatprep.mubr.bf16.mxu1 %v1050_v44 }
 0x215   : > { %2492 = vmatmul.mubr.bf16.gmra.mxu0 %v2831_v49 }
 0x216   : > { %2540 = vmatmul.mubr.bf16.gmra.mxu1 %v1051_v50  ;;  %2495 = vmatprep.mubr.bf16.mxu0 %v2832_v51 }
 0x217   : > { %2543 = vmatprep.mubr.bf16.mxu1 %v1052_v52 }
 0x21d   : > { %2496 = vmatmul.mubr.bf16.gmra.mxu0 %v2833_v57 }
 0x21e   : > { %2544 = vmatmul.mubr.bf16.gmra.mxu1 %v1053_v58  ;;  %2499 = vmatprep.mubr.bf16.mxu0 %v2834_v59 }
 0x21f   : > { %2547 = vmatprep.mubr.bf16.mxu1 %v1054_v60 }
 0x225   : > { %2500 = vmatmul.mubr.bf16.gmra.mxu0 %v2835_v1 }
 0x226   : > { %2548 = vmatmul.mubr.bf16.gmra.mxu1 %v1055_v2  ;;  %2503 = vmatprep.mubr.bf16.mxu0 %v2836_v3 }
 0x227   : > { %2551 = vmatprep.mubr.bf16.mxu1 %v1056_v4 }
 0x22d   : > { %2504 = vmatmul.mubr.bf16.gmra.mxu0 %v2837_v9 }
 0x22e   : > { %2552 = vmatmul.mubr.bf16.gmra.mxu1 %v1057_v10  ;;  %2507 = vmatprep.mubr.bf16.mxu0 %v2838_v11 }
 0x22f   : > { %2555 = vmatprep.mubr.bf16.mxu1 %v1058_v12 }
 0x235   : > { %2508 = vmatmul.mubr.bf16.gmra.mxu0 %v2839_v17 }
 0x236   : > { %2556 = vmatmul.mubr.bf16.gmra.mxu1 %v1059_v18  ;;  %2511 = vmatprep.mubr.bf16.mxu0 %v2840_v19 }
 0x237   : > { %2559 = vmatprep.mubr.bf16.mxu1 %v1060_v20 }
 0x23d   : > { %2512 = vmatmul.mubr.bf16.gmra.mxu0 %v2841_v25 }
 0x23e   : > { %2560 = vmatmul.mubr.bf16.gmra.mxu1 %v1061_v26  ;;  %2515 = vmatprep.mubr.bf16.mxu0 %v2842_v27 }
 0x23f   : > { %2563 = vmatprep.mubr.bf16.mxu1 %v1062_v28 }
 0x245   : > { %2516 = vmatmul.mubr.bf16.gmra.mxu0 %v2843_v31 }
 0x246   : > { %2564 = vmatmul.mubr.bf16.gmra.mxu1 %v1063_v32 }
 0x2cd   : > { %v2489_v33 = vpop.f32.mrf.mxu0 }
 0x2ce   : > { %v2537_v34 = vpop.f32.mrf.mxu1 }
 0x2cf   : > { %v1524_v35 = vadd.f32 %v2537_v34, %v2489_v33  ;;  %v1306_v36 = vpop.f32.mrf.mxu0 }
 0x2d0   : > { %v1515_v38 = vpop.f32.mrf.mxu1 }
 0x2d1   : > { %v1516_v39 = vadd.f32 %v1515_v38, %v1306_v36  ;;  %v2490_v40 = vpop.f32.mrf.mxu0  ;;  %v1651_v42 = vadd.f32 %v3548_v37, %v1524_v35 }
 0x2d2   : > { %v2538_v41 = vpop.f32.mrf.mxu1 }
 0x2d3   : > { %v1527_v43 = vadd.f32 %v2538_v41, %v2490_v40  ;;  %v1309_v44 = vpop.f32.mrf.mxu0  ;;  %v1649_v46 = vadd.f32 %v3548_v37, %v1516_v39  ;;  %v1683_v51 = vmax.f32 %v1651_v42, 0.0 }
 0x2d4   : > { %v1518_v45 = vpop.f32.mrf.mxu1 }
 0x2d5   : > { %v1652_v47 = vadd.f32 %v3548_v37, %v1527_v43  ;;  %v1519_v48 = vadd.f32 %v1518_v45, %v1309_v44  ;;  %v2493_v49 = vpop.f32.mrf.mxu0  ;;  %v1681_v57 = vmax.f32 %v1649_v46, 0.0 }
 0x2d6   : > { %v2541_v50 = vpop.f32.mrf.mxu1 }
 0x2d7   : > { %v1684_v52 = vmax.f32 %v1652_v47, 0.0  ;;  %v1650_v53 = vadd.f32 %v3548_v37, %v1519_v48  ;;  %v1540_v54 = vadd.f32 %v2541_v50, %v2493_v49  ;;  %v1322_v55 = vpop.f32.mrf.mxu0 }
 0x2d8   : > { %v1531_v56 = vpop.f32.mrf.mxu1 }
 0x2d9   : > { %v2224_v58 = vpack.c.bf16 %v1684_v52, %v1683_v51  ;;  %v1682_v59 = vmax.f32 %v1650_v53, 0.0  ;;  %v1532_v60 = vadd.f32 %v1531_v56, %v1322_v55  ;;  %v2494_v61 = vpop.f32.mrf.mxu0  ;;  %v1655_v0 = vadd.f32 %v3548_v37, %v1540_v54 }
 0x2da   : > { %v2542_v62 = vpop.f32.mrf.mxu1 }
 0x2db   : > { %2296 = vst [vmem:[%s3477_s30 + $0x8] sm:$0xff] %v2224_v58   ;;  %v2219_v63 = vpack.c.bf16 %v1682_v59, %v1681_v57  ;;  %v1543_v1 = vadd.f32 %v2542_v62, %v2494_v61  ;;  %v1325_v2 = vpop.f32.mrf.mxu0  ;;  %v1653_v4 = vadd.f32 %v3548_v37, %v1532_v60  ;;  %v1687_v9 = vmax.f32 %v1655_v0, 0.0 }
 0x2dc   : > { %v1534_v3 = vpop.f32.mrf.mxu1 }
 0x2dd   : > { %2220 = vst [vmem:[%s3477_s30] sm:$0xff] %v2219_v63   ;;  %v1656_v5 = vadd.f32 %v3548_v37, %v1543_v1  ;;  %v1535_v6 = vadd.f32 %v1534_v3, %v1325_v2  ;;  %v2497_v7 = vpop.f32.mrf.mxu0  ;;  %v1685_v15 = vmax.f32 %v1653_v4, 0.0 }
 0x2de   : > { %v2545_v8 = vpop.f32.mrf.mxu1 }
 0x2df   : > { %v1688_v10 = vmax.f32 %v1656_v5, 0.0  ;;  %v1654_v11 = vadd.f32 %v3548_v37, %v1535_v6  ;;  %v1556_v12 = vadd.f32 %v2545_v8, %v2497_v7  ;;  %v1338_v13 = vpop.f32.mrf.mxu0 }
 0x2e0   : > { %v1547_v14 = vpop.f32.mrf.mxu1 }
 0x2e1   : > { %v2234_v16 = vpack.c.bf16 %v1688_v10, %v1687_v9  ;;  %v1686_v17 = vmax.f32 %v1654_v11, 0.0  ;;  %v1548_v18 = vadd.f32 %v1547_v14, %v1338_v13  ;;  %v2498_v19 = vpop.f32.mrf.mxu0  ;;  %v1659_v22 = vadd.f32 %v3548_v37, %v1556_v12 }
 0x2e2   : > { %v2546_v20 = vpop.f32.mrf.mxu1 }
 0x2e3   : > { %2298 = vst [vmem:[%s3477_s30 + $0x18] sm:$0xff] %v2234_v16   ;;  %v2229_v21 = vpack.c.bf16 %v1686_v17, %v1685_v15  ;;  %v1559_v23 = vadd.f32 %v2546_v20, %v2498_v19  ;;  %v1341_v24 = vpop.f32.mrf.mxu0  ;;  %v1657_v26 = vadd.f32 %v3548_v37, %v1548_v18  ;;  %v1691_v31 = vmax.f32 %v1659_v22, 0.0 }
 0x2e4   : > { %v1550_v25 = vpop.f32.mrf.mxu1 }
 0x2e5   : > { %2297 = vst [vmem:[%s3477_s30 + $0x10] sm:$0xff] %v2229_v21   ;;  %v1660_v27 = vadd.f32 %v3548_v37, %v1559_v23  ;;  %v1551_v28 = vadd.f32 %v1550_v25, %v1341_v24  ;;  %v2501_v29 = vpop.f32.mrf.mxu0  ;;  %v1689_v38 = vmax.f32 %v1657_v26, 0.0 }
 0x2e6   : > { %v2549_v30 = vpop.f32.mrf.mxu1 }
 0x2e7   : > { %v1692_v32 = vmax.f32 %v1660_v27, 0.0  ;;  %v1658_v33 = vadd.f32 %v3548_v37, %v1551_v28  ;;  %v1572_v34 = vadd.f32 %v2549_v30, %v2501_v29  ;;  %v1354_v35 = vpop.f32.mrf.mxu0 }
 0x2e8   : > { %v1563_v36 = vpop.f32.mrf.mxu1 }
 0x2e9   : > { %v2244_v39 = vpack.c.bf16 %v1692_v32, %v1691_v31  ;;  %v1690_v40 = vmax.f32 %v1658_v33, 0.0  ;;  %v1564_v41 = vadd.f32 %v1563_v36, %v1354_v35  ;;  %v2502_v42 = vpop.f32.mrf.mxu0  ;;  %v1663_v45 = vadd.f32 %v3548_v37, %v1572_v34 }
 0x2ea   : > { %v2550_v43 = vpop.f32.mrf.mxu1 }
 0x2eb   : > { %2300 = vst [vmem:[%s3477_s30 + $0x28] sm:$0xff] %v2244_v39   ;;  %v2239_v44 = vpack.c.bf16 %v1690_v40, %v1689_v38  ;;  %v1575_v46 = vadd.f32 %v2550_v43, %v2502_v42  ;;  %v1357_v47 = vpop.f32.mrf.mxu0  ;;  %v1661_v49 = vadd.f32 %v3548_v37, %v1564_v41  ;;  %v1695_v54 = vmax.f32 %v1663_v45, 0.0 }
 0x2ec   : > { %v1566_v48 = vpop.f32.mrf.mxu1 }
 0x2ed   : > { %2299 = vst [vmem:[%s3477_s30 + $0x20] sm:$0xff] %v2239_v44   ;;  %v1664_v50 = vadd.f32 %v3548_v37, %v1575_v46  ;;  %v1567_v51 = vadd.f32 %v1566_v48, %v1357_v47  ;;  %v2505_v52 = vpop.f32.mrf.mxu0  ;;  %v1693_v60 = vmax.f32 %v1661_v49, 0.0 }
 0x2ee   : > { %v2553_v53 = vpop.f32.mrf.mxu1 }
 0x2ef   : > { %v1696_v55 = vmax.f32 %v1664_v50, 0.0  ;;  %v1662_v56 = vadd.f32 %v3548_v37, %v1567_v51  ;;  %v1588_v57 = vadd.f32 %v2553_v53, %v2505_v52  ;;  %v1370_v58 = vpop.f32.mrf.mxu0 }
 0x2f0   : > { %v1579_v59 = vpop.f32.mrf.mxu1 }
 0x2f1   : > { %v2254_v61 = vpack.c.bf16 %v1696_v55, %v1695_v54  ;;  %v1694_v62 = vmax.f32 %v1662_v56, 0.0  ;;  %v1580_v63 = vadd.f32 %v1579_v59, %v1370_v58  ;;  %v2506_v0 = vpop.f32.mrf.mxu0  ;;  %v1667_v3 = vadd.f32 %v3548_v37, %v1588_v57 }
 0x2f2   : > { %v2554_v1 = vpop.f32.mrf.mxu1 }
 0x2f3   : > { %2302 = vst [vmem:[%s3477_s30 + $0x38] sm:$0xff] %v2254_v61   ;;  %v2249_v2 = vpack.c.bf16 %v1694_v62, %v1693_v60  ;;  %v1591_v4 = vadd.f32 %v2554_v1, %v2506_v0  ;;  %v1373_v5 = vpop.f32.mrf.mxu0  ;;  %v1665_v7 = vadd.f32 %v3548_v37, %v1580_v63  ;;  %v1699_v12 = vmax.f32 %v1667_v3, 0.0 }
 0x2f4   : > { %v1582_v6 = vpop.f32.mrf.mxu1 }
 0x2f5   : > { %2301 = vst [vmem:[%s3477_s30 + $0x30] sm:$0xff] %v2249_v2   ;;  %v1668_v8 = vadd.f32 %v3548_v37, %v1591_v4  ;;  %v1583_v9 = vadd.f32 %v1582_v6, %v1373_v5  ;;  %v2509_v10 = vpop.f32.mrf.mxu0  ;;  %v1697_v18 = vmax.f32 %v1665_v7, 0.0 }
 0x2f6   : > { %v2557_v11 = vpop.f32.mrf.mxu1 }
 0x2f7   : > { %v1700_v13 = vmax.f32 %v1668_v8, 0.0  ;;  %v1666_v14 = vadd.f32 %v3548_v37, %v1583_v9  ;;  %v1604_v15 = vadd.f32 %v2557_v11, %v2509_v10  ;;  %v1386_v16 = vpop.f32.mrf.mxu0 }
 0x2f8   : > { %v1595_v17 = vpop.f32.mrf.mxu1 }
 0x2f9   : > { %v2264_v19 = vpack.c.bf16 %v1700_v13, %v1699_v12  ;;  %v1698_v20 = vmax.f32 %v1666_v14, 0.0  ;;  %v1596_v21 = vadd.f32 %v1595_v17, %v1386_v16  ;;  %v2510_v22 = vpop.f32.mrf.mxu0  ;;  %v1671_v25 = vadd.f32 %v3548_v37, %v1604_v15 }
 0x2fa   : > { %v2558_v23 = vpop.f32.mrf.mxu1 }
 0x2fb   : > { %2304 = vst [vmem:[%s3477_s30 + $0x48] sm:$0xff] %v2264_v19   ;;  %v2259_v24 = vpack.c.bf16 %v1698_v20, %v1697_v18  ;;  %v1607_v26 = vadd.f32 %v2558_v23, %v2510_v22  ;;  %v1389_v27 = vpop.f32.mrf.mxu0  ;;  %v1669_v29 = vadd.f32 %v3548_v37, %v1596_v21  ;;  %v1703_v34 = vmax.f32 %v1671_v25, 0.0 }
 0x2fc   : > { %v1598_v28 = vpop.f32.mrf.mxu1 }
 0x2fd   : > { %2303 = vst [vmem:[%s3477_s30 + $0x40] sm:$0xff] %v2259_v24   ;;  %v1672_v30 = vadd.f32 %v3548_v37, %v1607_v26  ;;  %v1599_v31 = vadd.f32 %v1598_v28, %v1389_v27  ;;  %v2513_v32 = vpop.f32.mrf.mxu0  ;;  %v1701_v41 = vmax.f32 %v1669_v29, 0.0 }
 0x2fe   : > { %v2561_v33 = vpop.f32.mrf.mxu1 }
 0x2ff   : > { %v1704_v35 = vmax.f32 %v1672_v30, 0.0  ;;  %v1670_v36 = vadd.f32 %v3548_v37, %v1599_v31  ;;  %v1620_v38 = vadd.f32 %v2561_v33, %v2513_v32  ;;  %v1402_v39 = vpop.f32.mrf.mxu0 }
 0x300   : > { %v1611_v40 = vpop.f32.mrf.mxu1 }
 0x301   : > { %v2274_v42 = vpack.c.bf16 %v1704_v35, %v1703_v34  ;;  %v1702_v43 = vmax.f32 %v1670_v36, 0.0  ;;  %v1612_v44 = vadd.f32 %v1611_v40, %v1402_v39  ;;  %v2514_v45 = vpop.f32.mrf.mxu0  ;;  %v1675_v48 = vadd.f32 %v3548_v37, %v1620_v38 }
 0x302   : > { %v2562_v46 = vpop.f32.mrf.mxu1 }
 0x303   : > { %2306 = vst [vmem:[%s3477_s30 + $0x58] sm:$0xff] %v2274_v42   ;;  %v2269_v47 = vpack.c.bf16 %v1702_v43, %v1701_v41  ;;  %v1623_v49 = vadd.f32 %v2562_v46, %v2514_v45  ;;  %v1405_v50 = vpop.f32.mrf.mxu0  ;;  %v1673_v52 = vadd.f32 %v3548_v37, %v1612_v44  ;;  %v1707_v57 = vmax.f32 %v1675_v48, 0.0 }
 0x304   : > { %v1614_v51 = vpop.f32.mrf.mxu1 }
 0x305   : > { %2305 = vst [vmem:[%s3477_s30 + $0x50] sm:$0xff] %v2269_v47   ;;  %v1676_v53 = vadd.f32 %v3548_v37, %v1623_v49  ;;  %v1615_v54 = vadd.f32 %v1614_v51, %v1405_v50  ;;  %v2517_v55 = vpop.f32.mrf.mxu0  ;;  %v1705_v63 = vmax.f32 %v1673_v52, 0.0 }
 0x306   : > { %v2565_v56 = vpop.f32.mrf.mxu1 }
 0x307   : > { %v1708_v58 = vmax.f32 %v1676_v53, 0.0  ;;  %v1674_v59 = vadd.f32 %v3548_v37, %v1615_v54  ;;  %v1636_v60 = vadd.f32 %v2565_v56, %v2517_v55  ;;  %v1418_v61 = vpop.f32.mrf.mxu0 }
 0x308   : > { %v1627_v62 = vpop.f32.mrf.mxu1 }
 0x309   : > { %v2284_v0 = vpack.c.bf16 %v1708_v58, %v1707_v57  ;;  %v1706_v1 = vmax.f32 %v1674_v59, 0.0  ;;  %v1628_v2 = vadd.f32 %v1627_v62, %v1418_v61  ;;  %v2518_v3 = vpop.f32.mrf.mxu0  ;;  %v1679_v6 = vadd.f32 %v3548_v37, %v1636_v60 }
 0x30a   : > { %v2566_v4 = vpop.f32.mrf.mxu1 }
 0x30b   : > { %2308 = vst [vmem:[%s3477_s30 + $0x68] sm:$0xff] %v2284_v0   ;;  %v2279_v5 = vpack.c.bf16 %v1706_v1, %v1705_v63  ;;  %v1639_v7 = vadd.f32 %v2566_v4, %v2518_v3  ;;  %v1421_v8 = vpop.f32.mrf.mxu0  ;;  %v1677_v10 = vadd.f32 %v3548_v37, %v1628_v2  ;;  %v1711_v13 = vmax.f32 %v1679_v6, 0.0 }
 0x30c   : > { %v1630_v9 = vpop.f32.mrf.mxu1 }
 0x30d   : > { %2307 = vst [vmem:[%s3477_s30 + $0x60] sm:$0xff] %v2279_v5   ;;  %v1680_v11 = vadd.f32 %v3548_v37, %v1639_v7  ;;  %v1631_v12 = vadd.f32 %v1630_v9, %v1421_v8  ;;  %v1709_v16 = vmax.f32 %v1677_v10, 0.0 }
 0x30f   : > { %v1712_v14 = vmax.f32 %v1680_v11, 0.0  ;;  %v1678_v15 = vadd.f32 %v3548_v37, %v1631_v12 }
 0x311   : > { %v2294_v17 = vpack.c.bf16 %v1712_v14, %v1711_v13  ;;  %v1710_v18 = vmax.f32 %v1678_v15, 0.0 }
 0x313   : > { %2310 = vst [vmem:[%s3477_s30 + $0x78] sm:$0xff] %v2294_v17   ;;  %v2289_v19 = vpack.c.bf16 %v1710_v18, %v1709_v16 }
 0x315   : > { %2309 = vst [vmem:[%s3477_s30 + $0x70] sm:$0xff] %v2289_v19  }
 0x316 PF: > { %s3759_s25 = sld [smem:[#allocation20_spill]]  ;;  %s1887_s3 = sshll.u32 %s3477_s30, 4  ;;  %s3605_s3 = int_to_ptr.vmem [resolvable:$true] %s1887_s3 }
 0x317   : > { %s3760_s24 = sld [smem:[#allocation32_spill]]  ;;  %s3609_s16 = scalar_lea.sflag [#allocation5], %s344_s4 }
 0x318   : > { %s2980_s13 = scalar_lea.vmem %s3605_s3, 2048  ;;  %s3149_s6 = smov [#allocation12]  }
 0x319   : > { %p2981_p5 = scmp.ne.s32.totalorder %s3605_s3, %s2980_s13  ;;  %s2984_s19 = sshll.u32 %s3149_s6, 4  ;;  %s2985_s19 = int_to_ptr.vmem [resolvable:$false] %s2984_s19 }
 0x31a   : > { %s2986_s11 = scalar_lea.vmem %s2985_s19, 4096  ;;  %p2987_p6 = scmp.lt.s32.totalorder %s3605_s3, %s2985_s19 }
 0x31b   : > { %p2982_p0 = pnand %p2981_p5, %p3421_p1  ;;  %p2988_p9 = scmp.lt.s32.totalorder %s2986_s11, %s2980_s13 }
 0x31c   : > { %s2215_s0 = sshll.u32 %s3759_s25, 11 }
 0x31d   : > { %s3761_s2 = smov %s3760_s24  ;;  %s3602_s14 = scalar_lea.hbm %s3760_s24, %s2215_s0 }
 0x31e   : > { %p2983_p3 = pneg %p2982_p0  ;;  %p2989_p11 = por %p2988_p9, %p2987_p6 }
 0x320   : > { %p2990_p13 = pnand %p2989_p11, %p2983_p3 }
 0x322   : > { %2993 = shalt.err (!%p2990_p13)
}
 0x323   : > { %s2994_s4 = scalar_lea.hbm %s3602_s14, 2048  ;;  %s2998_s27 = scalar_lea.hbm %s3761_s2, 4096 }
 0x324   : > { %p2995_p2 = scmp.ne.s32.totalorder %s3602_s14, %s2994_s4  ;;  %p2999_p4 = scmp.lt.s32.totalorder %s3602_s14, %s3761_s2 }
 0x325   : > { %p3000_p7 = scmp.lt.s32.totalorder %s2998_s27, %s2994_s4 }
 0x326   : > { %p2996_p8 = pnand %p2995_p2, %p3421_p1 }
 0x327   : > { %p3001_p12 = por %p3000_p7, %p2999_p4 }
 0x328   : > { %p2997_p10 = pneg %p2996_p8 }
 0x32a   : > { %p3002_p5 = pnand %p3001_p12, %p2997_p10 }
 0x32c   : > { %3005 = shalt.err (!%p3002_p5)
}
 0x32d   : > { %s3150_s0 = smov 64   ;;  %s3151_s15 = smov 4  }
 0x32e   : > { %2597 = dma.vmem_to_hbm [thread:$0]  (%p3421_p1), %s3605_s3, 2048, %s3602_s14, %s3609_s16, %s3150_s0, %s3150_s0, %s3151_s15  }
 0x32f PF: > { %p2625_p0 = scmp.ge.s32.totalorder %s3136_s10, 2  ;;  %s1902_s18 = sand.u32 1, %s3084_s21  }
 0x330   : > { %p3762_p3 = scmp.ne.s32.totalorder %s3745_s20, 0  ;;  %s1903_s24 = scalar_lea.sflag [#allocation5], %s1902_s18 }
 0x332   : > { %p2617_p6 = pnand %p2625_p0, %p3762_p3 }
 0x334   : > { %p2618_p9 = pneg %p2617_p6 }
 0x336   : > { %3079 = dma.done.wait (%p2618_p9), %s1903_s24, 2048  }
 0x337   : > { %3081 = vsyncadd (%p2618_p9), %s1903_s24, 4294965248  ;;  %s26_s10 = sadd.s32 1, %s3136_s10   ;;  %s3764_s24 = sld [smem:[#allocation18_spill]] }
 0x338   : > { %p3637_p11 = scmp.ge.s32.totalorder %s26_s10, 6   ;;  %s3765_s1 = sld [smem:[#allocation24_spill]] }
 0x339   : > { %s3766_s20 = sld [smem:[#allocation22_spill]]  ;;  %s3768_s21 = smov %s3088_s22 }
 0x33a   : > { %s3767_s14 = sld [smem:[#allocation23_spill]]  ;;  %s3769_s22 = smov %s3092_s23 }
 0x33b   : > { %s3770_s23 = smov %s3404_s17  ;;  %s3771_s25 = smov %s3104_s26 }
 0x33c   : > { %s3773_s27 = smov %s3112_s28  ;;  %s3774_s28 = smov %s3116_s29 }
 0x33d   : > { %s3775_s29 = smov %s3369_s12  ;;  %s3776_s30 = smov %s3128_s8 }
 0x33e   : > { %s3772_s26 = smov %s3765_s1  ;;  %s3777_s7 = smov %s3132_s9 }
 0x33f   : > { %s3778_s8 = smov %s3766_s20  ;;  %25 = sbr.rel (!%p3637_p11) target bundleno = 21 (0x15), region = 129 }
 0x340   : > { %s3779_s9 = smov %s3767_s14 }
 0x344   :  { %1908 = vsyncpa [#allocation4], 1 }
 0x345   :  { %1910 = vsyncpa [#allocation4 + $0x1], 1 }
 0x346   :  { %1911 = vsyncpa [#allocation7], 1 }
 0x347   :  { %1913 = vsyncpa [#allocation7 + $0x1], 1 }
 0x348   :  { %1914 = vsyncpa [#allocation10], 1 }
 0x349   :  { %1915 = vsyncpa [#allocation5], 1 }
 0x34a   :  { %1917 = vsyncpa [#allocation5 + $0x1], 1 }

</bundles_post_ra>
